<compile_context>
chip_gen: v6e
topology: v6e:2x2x1
jax: 0.10.0
libtpu: 0.0.40
codegen_flags: <defaults>
</compile_context>

<pallas_src>
import functools
import math

import jax
import jax.numpy as jnp
from jax import lax
from jax.experimental import pallas as pl
from jax.experimental.pallas import tpu as pltpu

LN_EPS = 1e-12


def _layer_norm(h, w, b):
    # TF-style LayerNorm: biased variance, eps inside the sqrt (rsqrt -> EUP).
    u = jnp.mean(h, axis=-1, keepdims=True)
    s = jnp.mean((h - u) ** 2, axis=-1, keepdims=True)
    return w * ((h - u) * lax.rsqrt(s + LN_EPS)) + b


def _gelu(x):
    # erf formulation, matching the PyTorch reference gelu().
    return x * 0.5 * (1.0 + lax.erf(x / math.sqrt(2.0)))


def _bert_layer_kernel(x_ref, mask_ref,
                       wq_ref, bq_ref, wk_ref, bk_ref, wv_ref, bv_ref,
                       wo_ref, bo_ref, ln1w_ref, ln1b_ref,
                       wi_ref, bi_ref, wo2_ref, bo2_ref, ln2w_ref, ln2b_ref,
                       out_ref, probs_ref, ctx_ref, *, num_heads, head_dim):
    x_f32 = x_ref[0].astype(jnp.float32)        # (S, H) residual / LN path
    x_bf = x_ref[0].astype(jnp.bfloat16)        # (S, H) matmul operand
    mask = mask_ref[0].astype(jnp.float32)      # (1, S) additive key mask
    S, H = x_f32.shape

    # --- BertSelfAttention: QKV projections (bf16 operands, f32 accum) ---
    q = jnp.dot(x_bf, wq_ref[...], preferred_element_type=jnp.float32) + bq_ref[...]
    k = jnp.dot(x_bf, wk_ref[...], preferred_element_type=jnp.float32) + bk_ref[...]
    v = jnp.dot(x_bf, wv_ref[...], preferred_element_type=jnp.float32) + bv_ref[...]

    # Pre-scale Q once (instead of per-head score scaling); hoist mask bcast.
    q = q * (1.0 / math.sqrt(head_dim))
    mask_sq = jnp.broadcast_to(mask, (S, S))

    q_bf = q.astype(jnp.bfloat16)
    k_bf = k.astype(jnp.bfloat16)
    v_bf = v.astype(jnp.bfloat16)

    for h in range(num_heads):                   # static, unrolled over heads
        lo = h * head_dim
        qh = q_bf[:, lo:lo + head_dim]
        kh = k_bf[:, lo:lo + head_dim]
        vh = v_bf[:, lo:lo + head_dim]
        # scores = qh @ kh^T : both operands contracted on their last dim
        # (MXU-native; no in-kernel transpose of kh).
        scores = lax.dot_general(qh, kh,
                                 dimension_numbers=(((1,), (1,)), ((), ())),
                                 preferred_element_type=jnp.float32)
        scores = scores + mask_sq
        m = jnp.max(scores, axis=-1, keepdims=True)
        e = jnp.exp(scores - m)
        inv_den = pl.reciprocal(jnp.sum(e, axis=-1, keepdims=True), approx=True)
        probs = e * inv_den
        probs_ref[0, h] = probs.astype(probs_ref.dtype)
        # TODO(synk): attention-probs dropout omitted (inference-mode identity).
        ctx_h = jnp.dot(probs.astype(jnp.bfloat16), vh,
                        preferred_element_type=jnp.float32)        # (S, dh)
        ctx_ref[:, lo:lo + head_dim] = ctx_h.astype(jnp.bfloat16)

    # --- BertSelfOutput: one full-depth (S,H)@(H,H) projection + residual + LN
    attn_acc = jnp.dot(ctx_ref[...], wo_ref[...],
                       preferred_element_type=jnp.float32)
    attn_out = _layer_norm(attn_acc + bo_ref[...] + x_f32,
                           ln1w_ref[...], ln1b_ref[...])

    # --- BertIntermediate: dense + gelu (gelu in f32) ---
    inter = jnp.dot(attn_out.astype(jnp.bfloat16), wi_ref[...],
                    preferred_element_type=jnp.float32) + bi_ref[...]
    inter = _gelu(inter)

    # --- BertOutput: dense + (dropout=id) + residual + LayerNorm ---
    out = jnp.dot(inter.astype(jnp.bfloat16), wo2_ref[...],
                  preferred_element_type=jnp.float32) + bo2_ref[...]
    out = _layer_norm(out + attn_out, ln2w_ref[...], ln2b_ref[...])
    out_ref[0] = out.astype(out_ref.dtype)


def bert_layer(hidden_states, attention_mask, params, num_heads):
    """hidden_states: (B, S, H) f32.  attention_mask: (B, S) additive mask.

    Returns (layer_output (B, S, H), attention_probs (B, nh, S, S))."""
    B, S, H = hidden_states.shape
    I = params["wi"].shape[0]            # intermediate size (torch weight is (I, H))
    assert H % num_heads == 0
    dh = H // num_heads

    # Pre-transpose every linear weight to (in, out) and cast to bf16 (native
    # MXU dtype; halves weight VMEM footprint).  Biases / LN params stay f32.
    wq_t = params["wq"].T.astype(jnp.bfloat16)
    wk_t = params["wk"].T.astype(jnp.bfloat16)
    wv_t = params["wv"].T.astype(jnp.bfloat16)
    wo_t = params["wo"].T.astype(jnp.bfloat16)     # (H, H)
    wi_t = params["wi"].T.astype(jnp.bfloat16)     # (H, I)
    wo2_t = params["wo2"].T.astype(jnp.bfloat16)   # (I, H)

    def row(v):                          # biases / LN params as lane-dense rows
        return v.reshape(1, -1).astype(jnp.float32)

    mask3 = attention_mask.reshape(B, 1, S).astype(jnp.float32)

    full = lambda b: (0, 0)
    kernel = functools.partial(_bert_layer_kernel,
                               num_heads=num_heads, head_dim=dh)

    # Advisory cost estimate so XLA schedules around this fused call sensibly.
    flops = 2 * B * S * (4 * H * H + 2 * S * H + 2 * H * I)
    transcendentals = B * S * (num_heads * S + I)
    bytes_accessed = (2 * (4 * H * H + 2 * H * I)              # bf16 weights
                      + 4 * (2 * B * S * H + B * num_heads * S * S))
    cost = pl.CostEstimate(flops=flops, transcendentals=transcendentals,
                           bytes_accessed=bytes_accessed)

    out, probs = pl.pallas_call(
        kernel,
        out_shape=(
            jax.ShapeDtypeStruct((B, S, H), hidden_states.dtype),
            jax.ShapeDtypeStruct((B, num_heads, S, S), jnp.float32),
        ),
        grid_spec=pltpu.PrefetchScalarGridSpec(
            num_scalar_prefetch=0,
            grid=(B,),
            in_specs=[
                pl.BlockSpec((1, S, H), lambda b: (b, 0, 0)),            # x
                pl.BlockSpec((1, 1, S), lambda b: (b, 0, 0)),            # mask
                pl.BlockSpec((H, H), full), pl.BlockSpec((1, H), full),  # Wq, bq
                pl.BlockSpec((H, H), full), pl.BlockSpec((1, H), full),  # Wk, bk
                pl.BlockSpec((H, H), full), pl.BlockSpec((1, H), full),  # Wv, bv
                pl.BlockSpec((H, H), full), pl.BlockSpec((1, H), full),  # Wo, bo
                pl.BlockSpec((1, H), full), pl.BlockSpec((1, H), full),  # LN1 w, b
                pl.BlockSpec((H, I), full), pl.BlockSpec((1, I), full),  # Wi, bi
                pl.BlockSpec((I, H), full), pl.BlockSpec((1, H), full),  # Wo2, bo2
                pl.BlockSpec((1, H), full), pl.BlockSpec((1, H), full),  # LN2 w, b
            ],
            out_specs=(
                pl.BlockSpec((1, S, H), lambda b: (b, 0, 0)),
                pl.BlockSpec((1, num_heads, S, S), lambda b: (b, 0, 0, 0)),
            ),
            scratch_shapes=[pltpu.VMEM((S, H), jnp.bfloat16)],   # ctx staging
        ),
        compiler_params=pltpu.CompilerParams(
            dimension_semantics=("parallel",),
            vmem_limit_bytes=48 * 1024 * 1024),
        cost_estimate=cost,
    )(hidden_states, mask3,
      wq_t, row(params["bq"]), wk_t, row(params["bk"]), wv_t, row(params["bv"]),
      wo_t, row(params["bo"]), row(params["ln1w"]), row(params["ln1b"]),
      wi_t, row(params["bi"]), wo2_t, row(params["bo2"]),
      row(params["ln2w"]), row(params["ln2b"]))

    return out, probs


def _reference(x, mask, params, num_heads):
    """Pure-JAX f32 reference matching the PyTorch BertLayer forward (eval)."""
    B, S, H = x.shape
    dh = H // num_heads
    lin = lambda t, w, b: t @ w.T + b

    def ln(h, w, b):
        u = jnp.mean(h, axis=-1, keepdims=True)
        s = jnp.mean((h - u) ** 2, axis=-1, keepdims=True)
        return w * ((h - u) / jnp.sqrt(s + LN_EPS)) + b

    def split(t):
        return t.reshape(B, S, num_heads, dh).transpose(0, 2, 1, 3)

    q = split(lin(x, params["wq"], params["bq"]))
    k = split(lin(x, params["wk"], params["bk"]))
    v = split(lin(x, params["wv"], params["bv"]))
    scores = jnp.einsum("bhqd,bhkd->bhqk", q, k) / math.sqrt(dh)
    scores = scores + mask[:, None, None, :]
    probs = jax.nn.softmax(scores, axis=-1)
    ctx = jnp.einsum("bhqk,bhkd->bhqd", probs, v)
    ctx = ctx.transpose(0, 2, 1, 3).reshape(B, S, H)
    attn = ln(lin(ctx, params["wo"], params["bo"]) + x,
              params["ln1w"], params["ln1b"])
    inter = _gelu(lin(attn, params["wi"], params["bi"]))
    out = ln(lin(inter, params["wo2"], params["bo2"]) + attn,
             params["ln2w"], params["ln2b"])
    return out, probs


if __name__ == "__main__":
    # Small TPU-tile-friendly BertLayer config:
    # batch=2, seq=8, hidden=128, heads=2 (head_dim=64), intermediate=512.
    B, S, H, NH, I = 2, 8, 128, 2, 512

    key = jax.random.PRNGKey(0)
    keys = jax.random.split(key, 12)

    def w(k, shape):
        return jax.random.normal(k, shape, dtype=jnp.float32) * 0.02

    hidden_states = jax.random.normal(keys[0], (B, S, H), dtype=jnp.float32)

    params = {
        "wq": w(keys[1], (H, H)), "bq": w(keys[2], (H,)),
        "wk": w(keys[3], (H, H)), "bk": w(keys[4], (H,)),
        "wv": w(keys[5], (H, H)), "bv": w(keys[6], (H,)),
        "wo": w(keys[7], (H, H)), "bo": w(keys[8], (H,)),
        "ln1w": jnp.ones((H,), jnp.float32), "ln1b": jnp.zeros((H,), jnp.float32),
        "wi": w(keys[9], (I, H)), "bi": w(keys[10], (I,)),
        "wo2": w(keys[11], (H, I)), "bo2": jnp.zeros((H,), jnp.float32),
        "ln2w": jnp.ones((H,), jnp.float32), "ln2b": jnp.zeros((H,), jnp.float32),
    }

    # Additive attention mask (BERT convention): batch 1 pads its last 3 keys.
    valid = jnp.ones((B, S), dtype=jnp.float32).at[1, S - 3:].set(0.0)
    attention_mask = (1.0 - valid) * -10000.0

    out, probs = bert_layer(hidden_states, attention_mask, params, NH)
    out = jax.block_until_ready(out)
    probs = jax.block_until_ready(probs)

    ref_out, ref_probs = _reference(hidden_states, attention_mask, params, NH)
    assert out.shape == (B, S, H) and probs.shape == (B, NH, S, S)
    # Tolerances loosened vs the pure-f32 version: matmuls now use bf16
    # operands (f32 accumulation) and softmax uses the approx EUP reciprocal.
    assert jnp.allclose(out, ref_out, atol=2e-2, rtol=2e-2), (
        float(jnp.max(jnp.abs(out - ref_out))))
    assert jnp.allclose(probs, ref_probs, atol=1e-2, rtol=1e-2), (
        float(jnp.max(jnp.abs(probs - ref_probs))))

    print("KERNEL_OK")
</pallas_src>

<mosaic_0001>
module attributes {stable_mosaic.version = 11 : i64} {
  func.func @_bert_layer_kernel(%arg0: i32, %arg1: memref<1x8x128xf32, #tpu.memory_space<vmem>>, %arg2: memref<1x1x8xf32, #tpu.memory_space<vmem>>, %arg3: memref<128x128xbf16, #tpu.memory_space<vmem>>, %arg4: memref<1x128xf32, #tpu.memory_space<vmem>>, %arg5: memref<128x128xbf16, #tpu.memory_space<vmem>>, %arg6: memref<1x128xf32, #tpu.memory_space<vmem>>, %arg7: memref<128x128xbf16, #tpu.memory_space<vmem>>, %arg8: memref<1x128xf32, #tpu.memory_space<vmem>>, %arg9: memref<128x128xbf16, #tpu.memory_space<vmem>>, %arg10: memref<1x128xf32, #tpu.memory_space<vmem>>, %arg11: memref<1x128xf32, #tpu.memory_space<vmem>>, %arg12: memref<1x128xf32, #tpu.memory_space<vmem>>, %arg13: memref<128x512xbf16, #tpu.memory_space<vmem>>, %arg14: memref<1x512xf32, #tpu.memory_space<vmem>>, %arg15: memref<512x128xbf16, #tpu.memory_space<vmem>>, %arg16: memref<1x128xf32, #tpu.memory_space<vmem>>, %arg17: memref<1x128xf32, #tpu.memory_space<vmem>>, %arg18: memref<1x128xf32, #tpu.memory_space<vmem>>, %arg19: memref<1x8x128xf32, #tpu.memory_space<vmem>>, %arg20: memref<1x2x8x8xf32, #tpu.memory_space<vmem>>, %arg21: memref<8x128xbf16, #tpu.memory_space<vmem>>) attributes {dimension_semantics = [#tpu.dimension_semantics<parallel>], iteration_bounds = array<i64: 2>, scalar_prefetch = 0 : i64, scratch_operands = 1 : i64, tpu.core_type = #tpu.core_type<tc>, window_params = [{transform_indices = @transform_0, window_bounds = array<i64: 1, 8, 128>}, {transform_indices = @transform_1, window_bounds = array<i64: 1, 1, 8>}, {pipeline_mode = #tpu.pipeline_mode<synchronous>, transform_indices = @transform_2, window_bounds = array<i64: 128, 128>}, {pipeline_mode = #tpu.pipeline_mode<synchronous>, transform_indices = @transform_3, window_bounds = array<i64: 1, 128>}, {pipeline_mode = #tpu.pipeline_mode<synchronous>, transform_indices = @transform_4, window_bounds = array<i64: 128, 128>}, {pipeline_mode = #tpu.pipeline_mode<synchronous>, transform_indices = @transform_5, window_bounds = array<i64: 1, 128>}, {pipeline_mode = #tpu.pipeline_mode<synchronous>, transform_indices = @transform_6, window_bounds = array<i64: 128, 128>}, {pipeline_mode = #tpu.pipeline_mode<synchronous>, transform_indices = @transform_7, window_bounds = array<i64: 1, 128>}, {pipeline_mode = #tpu.pipeline_mode<synchronous>, transform_indices = @transform_8, window_bounds = array<i64: 128, 128>}, {pipeline_mode = #tpu.pipeline_mode<synchronous>, transform_indices = @transform_9, window_bounds = array<i64: 1, 128>}, {pipeline_mode = #tpu.pipeline_mode<synchronous>, transform_indices = @transform_10, window_bounds = array<i64: 1, 128>}, {pipeline_mode = #tpu.pipeline_mode<synchronous>, transform_indices = @transform_11, window_bounds = array<i64: 1, 128>}, {pipeline_mode = #tpu.pipeline_mode<synchronous>, transform_indices = @transform_12, window_bounds = array<i64: 128, 512>}, {pipeline_mode = #tpu.pipeline_mode<synchronous>, transform_indices = @transform_13, window_bounds = array<i64: 1, 512>}, {pipeline_mode = #tpu.pipeline_mode<synchronous>, transform_indices = @transform_14, window_bounds = array<i64: 512, 128>}, {pipeline_mode = #tpu.pipeline_mode<synchronous>, transform_indices = @transform_15, window_bounds = array<i64: 1, 128>}, {pipeline_mode = #tpu.pipeline_mode<synchronous>, transform_indices = @transform_16, window_bounds = array<i64: 1, 128>}, {pipeline_mode = #tpu.pipeline_mode<synchronous>, transform_indices = @transform_17, window_bounds = array<i64: 1, 128>}, {transform_indices = @transform_18, window_bounds = array<i64: 1, 8, 128>}, {transform_indices = @transform_19, window_bounds = array<i64: 1, 2, 8, 8>}]} {
    %c0 = arith.constant 0 : index
    %c0_0 = arith.constant 0 : index
    %c0_1 = arith.constant 0 : index
    %0 = vector.load %arg1[%c0, %c0_0, %c0_1] : memref<1x8x128xf32, #tpu.memory_space<vmem>>, vector<1x8x128xf32>
    %1 = vector.shape_cast %0 : vector<1x8x128xf32> to vector<8x128xf32>
    %c0_2 = arith.constant 0 : index
    %c0_3 = arith.constant 0 : index
    %c0_4 = arith.constant 0 : index
    %2 = vector.load %arg1[%c0_2, %c0_3, %c0_4] : memref<1x8x128xf32, #tpu.memory_space<vmem>>, vector<1x8x128xf32>
    %3 = vector.shape_cast %2 : vector<1x8x128xf32> to vector<8x128xf32>
    %4 = arith.truncf %3 : vector<8x128xf32> to vector<8x128xbf16>
    %c0_5 = arith.constant 0 : index
    %c0_6 = arith.constant 0 : index
    %c0_7 = arith.constant 0 : index
    %5 = vector.load %arg2[%c0_5, %c0_6, %c0_7] : memref<1x1x8xf32, #tpu.memory_space<vmem>>, vector<1x1x8xf32>
    %6 = vector.shape_cast %5 : vector<1x1x8xf32> to vector<1x8xf32>
    %c0_8 = arith.constant 0 : index
    %c0_9 = arith.constant 0 : index
    %7 = vector.load %arg3[%c0_8, %c0_9] : memref<128x128xbf16, #tpu.memory_space<vmem>>, vector<128x128xbf16>
    %cst = arith.constant dense<0.000000e+00> : vector<8x128xf32>
    %8 = tpu.matmul %4, %7, %cst {dimension_numbers = #tpu.dot_dimension_numbers<[1], [0], [0], [1], [0, 0, 1, 1], [], []>} : vector<8x128xbf16>, vector<128x128xbf16>, vector<8x128xf32> -> vector<8x128xf32>
    %c0_10 = arith.constant 0 : index
    %c0_11 = arith.constant 0 : index
    %9 = vector.load %arg4[%c0_10, %c0_11] : memref<1x128xf32, #tpu.memory_space<vmem>>, vector<1x128xf32>
    %10 = vector.broadcast %9 : vector<1x128xf32> to vector<8x128xf32>
    %11 = arith.addf %8, %10 : vector<8x128xf32>
    %c0_12 = arith.constant 0 : index
    %c0_13 = arith.constant 0 : index
    %12 = vector.load %arg5[%c0_12, %c0_13] : memref<128x128xbf16, #tpu.memory_space<vmem>>, vector<128x128xbf16>
    %cst_14 = arith.constant dense<0.000000e+00> : vector<8x128xf32>
    %13 = tpu.matmul %4, %12, %cst_14 {dimension_numbers = #tpu.dot_dimension_numbers<[1], [0], [0], [1], [0, 0, 1, 1], [], []>} : vector<8x128xbf16>, vector<128x128xbf16>, vector<8x128xf32> -> vector<8x128xf32>
    %c0_15 = arith.constant 0 : index
    %c0_16 = arith.constant 0 : index
    %14 = vector.load %arg6[%c0_15, %c0_16] : memref<1x128xf32, #tpu.memory_space<vmem>>, vector<1x128xf32>
    %15 = vector.broadcast %14 : vector<1x128xf32> to vector<8x128xf32>
    %16 = arith.addf %13, %15 : vector<8x128xf32>
    %c0_17 = arith.constant 0 : index
    %c0_18 = arith.constant 0 : index
    %17 = vector.load %arg7[%c0_17, %c0_18] : memref<128x128xbf16, #tpu.memory_space<vmem>>, vector<128x128xbf16>
    %cst_19 = arith.constant dense<0.000000e+00> : vector<8x128xf32>
    %18 = tpu.matmul %4, %17, %cst_19 {dimension_numbers = #tpu.dot_dimension_numbers<[1], [0], [0], [1], [0, 0, 1, 1], [], []>} : vector<8x128xbf16>, vector<128x128xbf16>, vector<8x128xf32> -> vector<8x128xf32>
    %c0_20 = arith.constant 0 : index
    %c0_21 = arith.constant 0 : index
    %19 = vector.load %arg8[%c0_20, %c0_21] : memref<1x128xf32, #tpu.memory_space<vmem>>, vector<1x128xf32>
    %20 = vector.broadcast %19 : vector<1x128xf32> to vector<8x128xf32>
    %21 = arith.addf %18, %20 : vector<8x128xf32>
    %cst_22 = arith.constant 1.250000e-01 : f32
    %22 = vector.broadcast %cst_22 : f32 to vector<8x128xf32>
    %23 = arith.mulf %11, %22 : vector<8x128xf32>
    %24 = vector.shape_cast %6 : vector<1x8xf32> to vector<1x8xf32>
    %25 = vector.broadcast %24 : vector<1x8xf32> to vector<8x8xf32>
    %26 = arith.truncf %23 : vector<8x128xf32> to vector<8x128xbf16>
    %27 = arith.truncf %16 : vector<8x128xf32> to vector<8x128xbf16>
    %28 = arith.truncf %21 : vector<8x128xf32> to vector<8x128xbf16>
    %29 = vector.extract_strided_slice %26 {offsets = [0, 0], sizes = [8, 64], strides = [1, 1]} : vector<8x128xbf16> to vector<8x64xbf16>
    %30 = vector.extract_strided_slice %27 {offsets = [0, 0], sizes = [8, 64], strides = [1, 1]} : vector<8x128xbf16> to vector<8x64xbf16>
    %31 = vector.extract_strided_slice %28 {offsets = [0, 0], sizes = [8, 64], strides = [1, 1]} : vector<8x128xbf16> to vector<8x64xbf16>
    %cst_23 = arith.constant dense<0.000000e+00> : vector<8x8xf32>
    %32 = tpu.matmul %29, %30, %cst_23 {dimension_numbers = #tpu.dot_dimension_numbers<[1], [1], [0], [0], [0, 0, 1, 0], [], []>} : vector<8x64xbf16>, vector<8x64xbf16>, vector<8x8xf32> -> vector<8x8xf32>
    %33 = arith.addf %32, %25 : vector<8x8xf32>
    %cst_24 = arith.constant dense<0xFF800000> : vector<8xf32>
    %34 = vector.multi_reduction <maximumf>, %33, %cst_24 [1] : vector<8x8xf32> to vector<8xf32>
    %35 = vector.shape_cast %34 : vector<8xf32> to vector<8x1xf32>
    %36 = vector.broadcast %35 : vector<8x1xf32> to vector<8x8xf32>
    %37 = arith.subf %33, %36 : vector<8x8xf32>
    %38 = math.exp %37 : vector<8x8xf32>
    %cst_25 = arith.constant dense<0.000000e+00> : vector<8xf32>
    %39 = vector.multi_reduction <add>, %38, %cst_25 [1] : vector<8x8xf32> to vector<8xf32>
    %40 = vector.shape_cast %39 : vector<8xf32> to vector<8x1xf32>
    %41 = tpu.reciprocal %40 {approx = true} : vector<8x1xf32> -> vector<8x1xf32>
    %42 = vector.broadcast %41 : vector<8x1xf32> to vector<8x8xf32>
    %43 = arith.mulf %38, %42 : vector<8x8xf32>
    %c0_26 = arith.constant 0 : index
    %c0_27 = arith.constant 0 : index
    %c0_28 = arith.constant 0 : index
    %c0_29 = arith.constant 0 : index
    %44 = vector.load %arg20[%c0_26, %c0_27, %c0_28, %c0_29] : memref<1x2x8x8xf32, #tpu.memory_space<vmem>>, vector<1x1x8x8xf32>
    %45 = vector.shape_cast %44 : vector<1x1x8x8xf32> to vector<8x8xf32>
    %46 = vector.shape_cast %43 : vector<8x8xf32> to vector<1x1x8x8xf32>
    tpu.vector_store %arg20[%c0_26, %c0_27, %c0_28, %c0_29], %46 {strides = array<i32>} : memref<1x2x8x8xf32, #tpu.memory_space<vmem>>, vector<1x1x8x8xf32>,
    %47 = arith.truncf %43 : vector<8x8xf32> to vector<8x8xbf16>
    %cst_30 = arith.constant dense<0.000000e+00> : vector<8x64xf32>
    %48 = tpu.matmul %47, %31, %cst_30 {dimension_numbers = #tpu.dot_dimension_numbers<[1], [0], [0], [1], [0, 0, 1, 1], [], []>} : vector<8x8xbf16>, vector<8x64xbf16>, vector<8x64xf32> -> vector<8x64xf32>
    %49 = arith.truncf %48 : vector<8x64xf32> to vector<8x64xbf16>
    %c0_31 = arith.constant 0 : index
    %c0_32 = arith.constant 0 : index
    %50 = vector.load %arg21[%c0_31, %c0_32] : memref<8x128xbf16, #tpu.memory_space<vmem>>, vector<8x64xbf16>
    tpu.vector_store %arg21[%c0_31, %c0_32], %49 {strides = array<i32>} : memref<8x128xbf16, #tpu.memory_space<vmem>>, vector<8x64xbf16>,
    %51 = vector.extract_strided_slice %26 {offsets = [0, 64], sizes = [8, 64], strides = [1, 1]} : vector<8x128xbf16> to vector<8x64xbf16>
    %52 = vector.extract_strided_slice %27 {offsets = [0, 64], sizes = [8, 64], strides = [1, 1]} : vector<8x128xbf16> to vector<8x64xbf16>
    %53 = vector.extract_strided_slice %28 {offsets = [0, 64], sizes = [8, 64], strides = [1, 1]} : vector<8x128xbf16> to vector<8x64xbf16>
    %cst_33 = arith.constant dense<0.000000e+00> : vector<8x8xf32>
    %54 = tpu.matmul %51, %52, %cst_33 {dimension_numbers = #tpu.dot_dimension_numbers<[1], [1], [0], [0], [0, 0, 1, 0], [], []>} : vector<8x64xbf16>, vector<8x64xbf16>, vector<8x8xf32> -> vector<8x8xf32>
    %55 = arith.addf %54, %25 : vector<8x8xf32>
    %cst_34 = arith.constant dense<0xFF800000> : vector<8xf32>
    %56 = vector.multi_reduction <maximumf>, %55, %cst_34 [1] : vector<8x8xf32> to vector<8xf32>
    %57 = vector.shape_cast %56 : vector<8xf32> to vector<8x1xf32>
    %58 = vector.broadcast %57 : vector<8x1xf32> to vector<8x8xf32>
    %59 = arith.subf %55, %58 : vector<8x8xf32>
    %60 = math.exp %59 : vector<8x8xf32>
    %cst_35 = arith.constant dense<0.000000e+00> : vector<8xf32>
    %61 = vector.multi_reduction <add>, %60, %cst_35 [1] : vector<8x8xf32> to vector<8xf32>
    %62 = vector.shape_cast %61 : vector<8xf32> to vector<8x1xf32>
    %63 = tpu.reciprocal %62 {approx = true} : vector<8x1xf32> -> vector<8x1xf32>
    %64 = vector.broadcast %63 : vector<8x1xf32> to vector<8x8xf32>
    %65 = arith.mulf %60, %64 : vector<8x8xf32>
    %c0_36 = arith.constant 0 : index
    %c1 = arith.constant 1 : index
    %c0_37 = arith.constant 0 : index
    %c0_38 = arith.constant 0 : index
    %66 = vector.load %arg20[%c0_36, %c1, %c0_37, %c0_38] : memref<1x2x8x8xf32, #tpu.memory_space<vmem>>, vector<1x1x8x8xf32>
    %67 = vector.shape_cast %66 : vector<1x1x8x8xf32> to vector<8x8xf32>
    %68 = vector.shape_cast %65 : vector<8x8xf32> to vector<1x1x8x8xf32>
    tpu.vector_store %arg20[%c0_36, %c1, %c0_37, %c0_38], %68 {strides = array<i32>} : memref<1x2x8x8xf32, #tpu.memory_space<vmem>>, vector<1x1x8x8xf32>,
    %69 = arith.truncf %65 : vector<8x8xf32> to vector<8x8xbf16>
    %cst_39 = arith.constant dense<0.000000e+00> : vector<8x64xf32>
    %70 = tpu.matmul %69, %53, %cst_39 {dimension_numbers = #tpu.dot_dimension_numbers<[1], [0], [0], [1], [0, 0, 1, 1], [], []>} : vector<8x8xbf16>, vector<8x64xbf16>, vector<8x64xf32> -> vector<8x64xf32>
    %71 = arith.truncf %70 : vector<8x64xf32> to vector<8x64xbf16>
    %c0_40 = arith.constant 0 : index
    %c64 = arith.constant 64 : index
    %72 = vector.load %arg21[%c0_40, %c64] : memref<8x128xbf16, #tpu.memory_space<vmem>>, vector<8x64xbf16>
    tpu.vector_store %arg21[%c0_40, %c64], %71 {strides = array<i32>} : memref<8x128xbf16, #tpu.memory_space<vmem>>, vector<8x64xbf16>,
    %c0_41 = arith.constant 0 : index
    %c0_42 = arith.constant 0 : index
    %73 = vector.load %arg21[%c0_41, %c0_42] : memref<8x128xbf16, #tpu.memory_space<vmem>>, vector<8x128xbf16>
    %c0_43 = arith.constant 0 : index
    %c0_44 = arith.constant 0 : index
    %74 = vector.load %arg9[%c0_43, %c0_44] : memref<128x128xbf16, #tpu.memory_space<vmem>>, vector<128x128xbf16>
    %cst_45 = arith.constant dense<0.000000e+00> : vector<8x128xf32>
    %75 = tpu.matmul %73, %74, %cst_45 {dimension_numbers = #tpu.dot_dimension_numbers<[1], [0], [0], [1], [0, 0, 1, 1], [], []>} : vector<8x128xbf16>, vector<128x128xbf16>, vector<8x128xf32> -> vector<8x128xf32>
    %c0_46 = arith.constant 0 : index
    %c0_47 = arith.constant 0 : index
    %76 = vector.load %arg10[%c0_46, %c0_47] : memref<1x128xf32, #tpu.memory_space<vmem>>, vector<1x128xf32>
    %77 = vector.broadcast %76 : vector<1x128xf32> to vector<8x128xf32>
    %78 = arith.addf %75, %77 : vector<8x128xf32>
    %79 = arith.addf %78, %1 : vector<8x128xf32>
    %c0_48 = arith.constant 0 : index
    %c0_49 = arith.constant 0 : index
    %80 = vector.load %arg11[%c0_48, %c0_49] : memref<1x128xf32, #tpu.memory_space<vmem>>, vector<1x128xf32>
    %c0_50 = arith.constant 0 : index
    %c0_51 = arith.constant 0 : index
    %81 = vector.load %arg12[%c0_50, %c0_51] : memref<1x128xf32, #tpu.memory_space<vmem>>, vector<1x128xf32>
    %cst_52 = arith.constant dense<0.000000e+00> : vector<8xf32>
    %82 = vector.multi_reduction <add>, %79, %cst_52 [1] : vector<8x128xf32> to vector<8xf32>
    %83 = vector.shape_cast %82 : vector<8xf32> to vector<8x1xf32>
    %cst_53 = arith.constant 1.280000e+02 : f32
    %84 = vector.broadcast %cst_53 : f32 to vector<8x1xf32>
    %85 = arith.divf %83, %84 : vector<8x1xf32>
    %86 = vector.broadcast %85 : vector<8x1xf32> to vector<8x128xf32>
    %87 = arith.subf %79, %86 : vector<8x128xf32>
    %88 = arith.mulf %87, %87 : vector<8x128xf32>
    %cst_54 = arith.constant dense<0.000000e+00> : vector<8xf32>
    %89 = vector.multi_reduction <add>, %88, %cst_54 [1] : vector<8x128xf32> to vector<8xf32>
    %90 = vector.shape_cast %89 : vector<8xf32> to vector<8x1xf32>
    %cst_55 = arith.constant 1.280000e+02 : f32
    %91 = vector.broadcast %cst_55 : f32 to vector<8x1xf32>
    %92 = arith.divf %90, %91 : vector<8x1xf32>
    %93 = vector.broadcast %85 : vector<8x1xf32> to vector<8x128xf32>
    %94 = arith.subf %79, %93 : vector<8x128xf32>
    %cst_56 = arith.constant 9.99999996E-13 : f32
    %95 = vector.broadcast %cst_56 : f32 to vector<8x1xf32>
    %96 = arith.addf %92, %95 : vector<8x1xf32>
    %97 = math.rsqrt %96 : vector<8x1xf32>
    %98 = vector.broadcast %97 : vector<8x1xf32> to vector<8x128xf32>
    %99 = arith.mulf %94, %98 : vector<8x128xf32>
    %100 = vector.broadcast %80 : vector<1x128xf32> to vector<8x128xf32>
    %101 = arith.mulf %100, %99 : vector<8x128xf32>
    %102 = vector.broadcast %81 : vector<1x128xf32> to vector<8x128xf32>
    %103 = arith.addf %101, %102 : vector<8x128xf32>
    %104 = arith.truncf %103 : vector<8x128xf32> to vector<8x128xbf16>
    %c0_57 = arith.constant 0 : index
    %c0_58 = arith.constant 0 : index
    %105 = vector.load %arg13[%c0_57, %c0_58] : memref<128x512xbf16, #tpu.memory_space<vmem>>, vector<128x512xbf16>
    %cst_59 = arith.constant dense<0.000000e+00> : vector<8x512xf32>
    %106 = tpu.matmul %104, %105, %cst_59 {dimension_numbers = #tpu.dot_dimension_numbers<[1], [0], [0], [1], [0, 0, 1, 1], [], []>} : vector<8x128xbf16>, vector<128x512xbf16>, vector<8x512xf32> -> vector<8x512xf32>
    %c0_60 = arith.constant 0 : index
    %c0_61 = arith.constant 0 : index
    %107 = vector.load %arg14[%c0_60, %c0_61] : memref<1x512xf32, #tpu.memory_space<vmem>>, vector<1x512xf32>
    %108 = vector.broadcast %107 : vector<1x512xf32> to vector<8x512xf32>
    %109 = arith.addf %106, %108 : vector<8x512xf32>
    %cst_62 = arith.constant 5.000000e-01 : f32
    %110 = vector.broadcast %cst_62 : f32 to vector<8x512xf32>
    %111 = arith.mulf %109, %110 : vector<8x512xf32>
    %cst_63 = arith.constant 1.41421354 : f32
    %112 = vector.broadcast %cst_63 : f32 to vector<8x512xf32>
    %113 = arith.divf %109, %112 : vector<8x512xf32>
    %114 = math.erf %113 : vector<8x512xf32>
    %cst_64 = arith.constant 1.000000e+00 : f32
    %115 = vector.broadcast %cst_64 : f32 to vector<8x512xf32>
    %116 = arith.addf %115, %114 : vector<8x512xf32>
    %117 = arith.mulf %111, %116 : vector<8x512xf32>
    %118 = arith.truncf %117 : vector<8x512xf32> to vector<8x512xbf16>
    %c0_65 = arith.constant 0 : index
    %c0_66 = arith.constant 0 : index
    %119 = vector.load %arg15[%c0_65, %c0_66] : memref<512x128xbf16, #tpu.memory_space<vmem>>, vector<512x128xbf16>
    %cst_67 = arith.constant dense<0.000000e+00> : vector<8x128xf32>
    %120 = tpu.matmul %118, %119, %cst_67 {dimension_numbers = #tpu.dot_dimension_numbers<[1], [0], [0], [1], [0, 0, 1, 1], [], []>} : vector<8x512xbf16>, vector<512x128xbf16>, vector<8x128xf32> -> vector<8x128xf32>
    %c0_68 = arith.constant 0 : index
    %c0_69 = arith.constant 0 : index
    %121 = vector.load %arg16[%c0_68, %c0_69] : memref<1x128xf32, #tpu.memory_space<vmem>>, vector<1x128xf32>
    %122 = vector.broadcast %121 : vector<1x128xf32> to vector<8x128xf32>
    %123 = arith.addf %120, %122 : vector<8x128xf32>
    %124 = arith.addf %123, %103 : vector<8x128xf32>
    %c0_70 = arith.constant 0 : index
    %c0_71 = arith.constant 0 : index
    %125 = vector.load %arg17[%c0_70, %c0_71] : memref<1x128xf32, #tpu.memory_space<vmem>>, vector<1x128xf32>
    %c0_72 = arith.constant 0 : index
    %c0_73 = arith.constant 0 : index
    %126 = vector.load %arg18[%c0_72, %c0_73] : memref<1x128xf32, #tpu.memory_space<vmem>>, vector<1x128xf32>
    %cst_74 = arith.constant dense<0.000000e+00> : vector<8xf32>
    %127 = vector.multi_reduction <add>, %124, %cst_74 [1] : vector<8x128xf32> to vector<8xf32>
    %128 = vector.shape_cast %127 : vector<8xf32> to vector<8x1xf32>
    %cst_75 = arith.constant 1.280000e+02 : f32
    %129 = vector.broadcast %cst_75 : f32 to vector<8x1xf32>
    %130 = arith.divf %128, %129 : vector<8x1xf32>
    %131 = vector.broadcast %130 : vector<8x1xf32> to vector<8x128xf32>
    %132 = arith.subf %124, %131 : vector<8x128xf32>
    %133 = arith.mulf %132, %132 : vector<8x128xf32>
    %cst_76 = arith.constant dense<0.000000e+00> : vector<8xf32>
    %134 = vector.multi_reduction <add>, %133, %cst_76 [1] : vector<8x128xf32> to vector<8xf32>
    %135 = vector.shape_cast %134 : vector<8xf32> to vector<8x1xf32>
    %cst_77 = arith.constant 1.280000e+02 : f32
    %136 = vector.broadcast %cst_77 : f32 to vector<8x1xf32>
    %137 = arith.divf %135, %136 : vector<8x1xf32>
    %138 = vector.broadcast %130 : vector<8x1xf32> to vector<8x128xf32>
    %139 = arith.subf %124, %138 : vector<8x128xf32>
    %cst_78 = arith.constant 9.99999996E-13 : f32
    %140 = vector.broadcast %cst_78 : f32 to vector<8x1xf32>
    %141 = arith.addf %137, %140 : vector<8x1xf32>
    %142 = math.rsqrt %141 : vector<8x1xf32>
    %143 = vector.broadcast %142 : vector<8x1xf32> to vector<8x128xf32>
    %144 = arith.mulf %139, %143 : vector<8x128xf32>
    %145 = vector.broadcast %125 : vector<1x128xf32> to vector<8x128xf32>
    %146 = arith.mulf %145, %144 : vector<8x128xf32>
    %147 = vector.broadcast %126 : vector<1x128xf32> to vector<8x128xf32>
    %148 = arith.addf %146, %147 : vector<8x128xf32>
    %c0_79 = arith.constant 0 : index
    %c0_80 = arith.constant 0 : index
    %c0_81 = arith.constant 0 : index
    %149 = vector.load %arg19[%c0_79, %c0_80, %c0_81] : memref<1x8x128xf32, #tpu.memory_space<vmem>>, vector<1x8x128xf32>
    %150 = vector.shape_cast %149 : vector<1x8x128xf32> to vector<8x128xf32>
    %151 = vector.shape_cast %148 : vector<8x128xf32> to vector<1x8x128xf32>
    tpu.vector_store %arg19[%c0_79, %c0_80, %c0_81], %151 {strides = array<i32>} : memref<1x8x128xf32, #tpu.memory_space<vmem>>, vector<1x8x128xf32>,
    return
  }
  func.func @transform_0(%arg0: i32) -> (i32, i32, i32) {
    %c0_i32 = arith.constant 0 : i32
    %c0_i32_0 = arith.constant 0 : i32
    %c0_i32_1 = arith.constant 0 : i32
    return %arg0, %c0_i32, %c0_i32_0 : i32, i32, i32
  }
  func.func @transform_1(%arg0: i32) -> (i32, i32, i32) {
    %c0_i32 = arith.constant 0 : i32
    %c0_i32_0 = arith.constant 0 : i32
    %c0_i32_1 = arith.constant 0 : i32
    return %arg0, %c0_i32, %c0_i32_0 : i32, i32, i32
  }
  func.func @transform_2(%arg0: i32) -> (i32, i32) {
    %c0_i32 = arith.constant 0 : i32
    %c0_i32_0 = arith.constant 0 : i32
    %c0_i32_1 = arith.constant 0 : i32
    return %c0_i32, %c0_i32_0 : i32, i32
  }
  func.func @transform_3(%arg0: i32) -> (i32, i32) {
    %c0_i32 = arith.constant 0 : i32
    %c0_i32_0 = arith.constant 0 : i32
    %c0_i32_1 = arith.constant 0 : i32
    return %c0_i32, %c0_i32_0 : i32, i32
  }
  func.func @transform_4(%arg0: i32) -> (i32, i32) {
    %c0_i32 = arith.constant 0 : i32
    %c0_i32_0 = arith.constant 0 : i32
    %c0_i32_1 = arith.constant 0 : i32
    return %c0_i32, %c0_i32_0 : i32, i32
  }
  func.func @transform_5(%arg0: i32) -> (i32, i32) {
    %c0_i32 = arith.constant 0 : i32
    %c0_i32_0 = arith.constant 0 : i32
    %c0_i32_1 = arith.constant 0 : i32
    return %c0_i32, %c0_i32_0 : i32, i32
  }
  func.func @transform_6(%arg0: i32) -> (i32, i32) {
    %c0_i32 = arith.constant 0 : i32
    %c0_i32_0 = arith.constant 0 : i32
    %c0_i32_1 = arith.constant 0 : i32
    return %c0_i32, %c0_i32_0 : i32, i32
  }
  func.func @transform_7(%arg0: i32) -> (i32, i32) {
    %c0_i32 = arith.constant 0 : i32
    %c0_i32_0 = arith.constant 0 : i32
    %c0_i32_1 = arith.constant 0 : i32
    return %c0_i32, %c0_i32_0 : i32, i32
  }
  func.func @transform_8(%arg0: i32) -> (i32, i32) {
    %c0_i32 = arith.constant 0 : i32
    %c0_i32_0 = arith.constant 0 : i32
    %c0_i32_1 = arith.constant 0 : i32
    return %c0_i32, %c0_i32_0 : i32, i32
  }
  func.func @transform_9(%arg0: i32) -> (i32, i32) {
    %c0_i32 = arith.constant 0 : i32
    %c0_i32_0 = arith.constant 0 : i32
    %c0_i32_1 = arith.constant 0 : i32
    return %c0_i32, %c0_i32_0 : i32, i32
  }
  func.func @transform_10(%arg0: i32) -> (i32, i32) {
    %c0_i32 = arith.constant 0 : i32
    %c0_i32_0 = arith.constant 0 : i32
    %c0_i32_1 = arith.constant 0 : i32
    return %c0_i32, %c0_i32_0 : i32, i32
  }
  func.func @transform_11(%arg0: i32) -> (i32, i32) {
    %c0_i32 = arith.constant 0 : i32
    %c0_i32_0 = arith.constant 0 : i32
    %c0_i32_1 = arith.constant 0 : i32
    return %c0_i32, %c0_i32_0 : i32, i32
  }
  func.func @transform_12(%arg0: i32) -> (i32, i32) {
    %c0_i32 = arith.constant 0 : i32
    %c0_i32_0 = arith.constant 0 : i32
    %c0_i32_1 = arith.constant 0 : i32
    return %c0_i32, %c0_i32_0 : i32, i32
  }
  func.func @transform_13(%arg0: i32) -> (i32, i32) {
    %c0_i32 = arith.constant 0 : i32
    %c0_i32_0 = arith.constant 0 : i32
    %c0_i32_1 = arith.constant 0 : i32
    return %c0_i32, %c0_i32_0 : i32, i32
  }
  func.func @transform_14(%arg0: i32) -> (i32, i32) {
    %c0_i32 = arith.constant 0 : i32
    %c0_i32_0 = arith.constant 0 : i32
    %c0_i32_1 = arith.constant 0 : i32
    return %c0_i32, %c0_i32_0 : i32, i32
  }
  func.func @transform_15(%arg0: i32) -> (i32, i32) {
    %c0_i32 = arith.constant 0 : i32
    %c0_i32_0 = arith.constant 0 : i32
    %c0_i32_1 = arith.constant 0 : i32
    return %c0_i32, %c0_i32_0 : i32, i32
  }
  func.func @transform_16(%arg0: i32) -> (i32, i32) {
    %c0_i32 = arith.constant 0 : i32
    %c0_i32_0 = arith.constant 0 : i32
    %c0_i32_1 = arith.constant 0 : i32
    return %c0_i32, %c0_i32_0 : i32, i32
  }
  func.func @transform_17(%arg0: i32) -> (i32, i32) {
    %c0_i32 = arith.constant 0 : i32
    %c0_i32_0 = arith.constant 0 : i32
    %c0_i32_1 = arith.constant 0 : i32
    return %c0_i32, %c0_i32_0 : i32, i32
  }
  func.func @transform_18(%arg0: i32) -> (i32, i32, i32) {
    %c0_i32 = arith.constant 0 : i32
    %c0_i32_0 = arith.constant 0 : i32
    %c0_i32_1 = arith.constant 0 : i32
    return %arg0, %c0_i32, %c0_i32_0 : i32, i32, i32
  }
  func.func @transform_19(%arg0: i32) -> (i32, i32, i32, i32) {
    %c0_i32 = arith.constant 0 : i32
    %c0_i32_0 = arith.constant 0 : i32
    %c0_i32_1 = arith.constant 0 : i32
    %c0_i32_2 = arith.constant 0 : i32
    return %arg0, %c0_i32, %c0_i32_0, %c0_i32_1 : i32, i32, i32, i32
  }
}

</mosaic_0001>

<bundles_post_ra>
// kernel: tpu_custom_call.1
= control target key start
LH: loop header
LB: loop body
LE: loop exit
PB: predicated region body
PF: predicated region fallthrough
CT: control target
= control target key end

     0   :  { %s3868_s0 = inlined_call_operand.hbm [shape: f32[2,8,128], index: 0, kind: input, shape index: {}]   ;;  %s3869_s1 = inlined_call_operand.hbm [shape: f32[2,1,8], index: 1, kind: input, shape index: {}]   ;;  %s3870_s2 = inlined_call_operand.hbm [shape: bf16[128,128], index: 2, kind: input, shape index: {}]   ;;  %s3871_s3 = inlined_call_operand.vmem [shape: f32[1,128], index: 3, kind: input, shape index: {}]   ;;  %s3872_s4 = inlined_call_operand.hbm [shape: bf16[128,128], index: 4, kind: input, shape index: {}]   ;;  %s3873_s5 = inlined_call_operand.vmem [shape: f32[1,128], index: 5, kind: input, shape index: {}]   ;;  %s3874_s6 = inlined_call_operand.hbm [shape: bf16[128,128], index: 6, kind: input, shape index: {}]   ;;  %s3875_s7 = inlined_call_operand.vmem [shape: f32[1,128], index: 7, kind: input, shape index: {}]   ;;  %s3876_s8 = inlined_call_operand.hbm [shape: bf16[128,128], index: 8, kind: input, shape index: {}]   ;;  %s3877_s9 = inlined_call_operand.vmem [shape: f32[1,128], index: 9, kind: input, shape index: {}]   ;;  %s3878_s10 = inlined_call_operand.vmem [shape: f32[1,128], index: 10, kind: input, shape index: {}]   ;;  %s3879_s11 = inlined_call_operand.vmem [shape: f32[1,128], index: 11, kind: input, shape index: {}]   ;;  %s3880_s12 = inlined_call_operand.hbm [shape: bf16[128,512], index: 12, kind: input, shape index: {}]   ;;  %s3881_s13 = inlined_call_operand.vmem [shape: f32[1,512], index: 13, kind: input, shape index: {}]   ;;  %s3882_s14 = inlined_call_operand.hbm [shape: bf16[512,128], index: 14, kind: input, shape index: {}]   ;;  %s3883_s15 = inlined_call_operand.vmem [shape: f32[1,128], index: 15, kind: input, shape index: {}]   ;;  %s3884_s16 = inlined_call_operand.vmem [shape: f32[1,128], index: 16, kind: input, shape index: {}]   ;;  %s3885_s17 = inlined_call_operand.vmem [shape: f32[1,128], index: 17, kind: input, shape index: {}]   ;;  %s3886_s18 = inlined_call_operand.hbm [shape: f32[2,8,128], index: 18, kind: output, shape index: {0}]   ;;  %s3887_s19 = inlined_call_operand.hbm [shape: f32[2,2,8,8], index: 19, kind: output, shape index: {1}]  }
   0x1   :  { %3902 = sst [smem:[#allocation33_spill]] %s3868_s0 }
   0x2   :  { %3903 = sst [smem:[#allocation34_spill]] %s3869_s1 }
   0x3   :  { %3904 = sst [smem:[#allocation35_spill]] %s3870_s2 }
   0x4   :  { %3905 = sst [smem:[#allocation36_spill]] %s3871_s3 }
   0x5   :  { %3906 = sst [smem:[#allocation37_spill]] %s3872_s4 }
   0x6   :  { %3907 = sst [smem:[#allocation38_spill]] %s3874_s6 }
   0x7   :  { %3908 = sst [smem:[#allocation39_spill]] %s3876_s8 }
   0x8   :  { %3909 = sst [smem:[#allocation40_spill]] %s3880_s12 }
   0x9   :  { %3910 = sst [smem:[#allocation41_spill]] %s3882_s14 }
   0xa   :  { %3911 = sst [smem:[#allocation42_spill]] %s3884_s16 }
   0xb   :  { %3912 = sst [smem:[#allocation43_spill]] %s3885_s17 }
   0xc   :  { %3913 = sst [smem:[#allocation44_spill]] %s3886_s18 }
   0xd   :  { %25 = vsyncpa [#allocation4], 0 }
   0xe   :  { %27 = vsyncpa [#allocation4 + $0x1], 0 }
   0xf   :  { %28 = vsyncpa [#allocation7], 0 }
  0x10   :  { %30 = vsyncpa [#allocation7 + $0x1], 0 }
  0x11   :  { %31 = vsyncpa [#allocation10], 0 }
  0x12   :  { %32 = vsyncpa [#allocation13], 0 }
  0x13   :  { %33 = vsyncpa [#allocation16], 0 }
  0x14   :  { %34 = vsyncpa [#allocation5], 0 }
  0x15   :  { %36 = vsyncpa [#allocation5 + $0x1], 0 }
  0x16   :  { %37 = vsyncpa [#allocation19], 0 }
  0x17   :  { %39 = vsyncpa [#allocation19 + $0x1], 0  ;;  %s3423_s0 = smov 0   ;;  %s3425_s30 = smov 0  }
  0x18   :  { %s3427_s20 = smov 0   ;;  %s3429_s21 = smov 0  }
  0x19 LB: > { %3914 = sst [smem:[#allocation28_spill]] %s3289_s0  ;;  %s3303_s1 = smov [#allocation8]   ;;  %s3301_s21 = sphi %s3429_s21, %s3956_s21   ;;  %s3297_s20 = sphi %s3427_s20, %s3958_s20   ;;  %s3293_s30 = sphi %s3425_s30, %s3960_s30   ;;  %s3289_s0 = sphi %s3423_s0, %s3959_s0  }
  0x1a   : > { %3915 = sst [smem:[#allocation29_spill]] %s3297_s20  ;;  %s502_s22 = sshll.u32 %s3303_s1, 4  ;;  %s503_s22 = int_to_ptr.vmem [resolvable:$true] %s502_s22 }
  0x1b   : > { %s3444_s2 = sadd.s32 4294967295, %s3301_s21   ;;  %p2382_p0 = scmp.ge.s32.totalorder %s3301_s21, 1 }
  0x1c   : > { %p3893_p1 = scmp.eq.s32.totalorder %s3444_s2, 0  ;;  %p490_p2 = scmp.lt.s32.totalorder %s3301_s21, 3 }
  0x1d   : > { %s3304_s24 = smov [#allocation9]   ;;  %s3305_s26 = smov [#allocation12]  }
  0x1e   : > { %p3449_p3 = pnand %p2382_p0, %p490_p2  ;;  %s518_s25 = sshll.u32 %s3304_s24, 4  ;;  %s3462_s25 = int_to_ptr.vmem [resolvable:$true] %s518_s25 }
  0x1f   : > { %s550_s27 = sshll.u32 %s3305_s26, 4  ;;  %s2986_s29 = scalar_lea.vmem %s503_s22, 1024  ;;  %s3464_s27 = int_to_ptr.vmem [resolvable:$true] %s550_s27 }
  0x20   : > { %s3916_s23 = scalar_select %p3449_p3, 1, 0 }
  0x21   : > { %p2748_p5 = pneg %p3449_p3  ;;  %p2987_p8 = scmp.ne.s32.totalorder %s503_s22, %s2986_s29 }
  0x22   : > { %p2994_p11 = scmp.lt.s32.totalorder %s503_s22, %s503_s22  ;;  %p2995_p12 = scmp.lt.s32.totalorder %s2986_s29, %s2986_s29 }
  0x23   : > { %p3458_p6 = pnand %p2748_p5, %p3893_p1 }
  0x24   : > { %p2996_p13 = por %p2995_p12, %p2994_p11 }
  0x25   : > { %p3468_p7 = pneg %p3458_p6 }
  0x27   : > { %p2989_p9 = pnand %p2987_p8, %p3468_p7 }
  0x29   : > { %p2990_p10 = pneg %p2989_p9 }
  0x2b   : > { %p2997_p0 = pnand %p2996_p13, %p2990_p10 }
  0x2d   : > { %3000 = shalt.err (!%p2997_p0)
}
  0x2e   : > { %s3891_s1 = smov 64   ;;  %s3307_s24 = smov 4  }
  0x2f   : > { %s3919_s17 = sld [smem:[#allocation35_spill]]  ;;  %s3012_s16 = scalar_lea.vmem %s3462_s25, 1024 }
  0x30   : > { %p3013_p2 = scmp.ne.s32.totalorder %s3462_s25, %s3012_s16  ;;  %p3020_p9 = scmp.lt.s32.totalorder %s3462_s25, %s3462_s25 }
  0x31   : > { %p3021_p10 = scmp.lt.s32.totalorder %s3012_s16, %s3012_s16 }
  0x32   : > { %p3015_p5 = pnand %p3013_p2, %p3468_p7 }
  0x33   : > { %p3022_p11 = por %p3021_p10, %p3020_p9 }
  0x34   : > { %p3016_p8 = pneg %p3015_p5 }
  0x35   : > { %2751 = dma.hbm_to_vmem [thread:$0]  (!%p3458_p6), %s3919_s17, 1024, %s503_s22, [#allocation7], %s3891_s1, %s3891_s1, %s3307_s24  }
  0x36   : > { %p3023_p12 = pnand %p3022_p11, %p3016_p8 }
  0x38   : > { %3026 = shalt.err (!%p3023_p12)
}
  0x39   : > { %s3920_s4 = sld [smem:[#allocation37_spill]]  ;;  %s3038_s17 = scalar_lea.vmem %s3464_s27, 1024 }
  0x3a   : > { %p3039_p13 = scmp.ne.s32.totalorder %s3464_s27, %s3038_s17  ;;  %p3046_p5 = scmp.lt.s32.totalorder %s3464_s27, %s3464_s27 }
  0x3b   : > { %p3047_p8 = scmp.lt.s32.totalorder %s3038_s17, %s3038_s17 }
  0x3c   : > { %p3041_p0 = pnand %p3039_p13, %p3468_p7 }
  0x3d   : > { %p3048_p9 = por %p3047_p8, %p3046_p5 }
  0x3e   : > { %p3042_p2 = pneg %p3041_p0 }
  0x3f   : > { %2754 = dma.hbm_to_vmem [thread:$0]  (!%p3458_p6), %s3920_s4, 1024, %s3462_s25, [#allocation10], %s3891_s1, %s3891_s1, %s3307_s24  }
  0x40   : > { %p3049_p10 = pnand %p3048_p9, %p3042_p2 }
  0x42   : > { %3052 = shalt.err (!%p3049_p10)
}
  0x43   : > { %s3921_s8 = sld [smem:[#allocation39_spill]]  ;;  %s3308_s25 = smov [#allocation11]  }
  0x44   : > { %s534_s26 = sshll.u32 %s3308_s25, 4  ;;  %s3309_s29 = smov [#allocation14]   ;;  %s535_s26 = int_to_ptr.vmem [resolvable:$true] %s534_s26 }
  0x45   : > { %s572_s18 = sshll.u32 %s3309_s29, 4  ;;  %s3064_s17 = scalar_lea.vmem %s535_s26, 1024  ;;  %s573_s18 = int_to_ptr.vmem [resolvable:$true] %s572_s18 }
  0x46   : > { %p3065_p11 = scmp.ne.s32.totalorder %s535_s26, %s3064_s17  ;;  %p3072_p0 = scmp.lt.s32.totalorder %s535_s26, %s535_s26 }
  0x47   : > { %p3073_p2 = scmp.lt.s32.totalorder %s3064_s17, %s3064_s17 }
  0x48   : > { %p3067_p12 = pnand %p3065_p11, %p3468_p7 }
  0x49   : > { %2760 = dma.hbm_to_vmem [thread:$0]  (!%p3458_p6), %s3921_s8, 1024, %s3464_s27, [#allocation13], %s3891_s1, %s3891_s1, %s3307_s24  }
  0x4a   : > { %p3068_p13 = pneg %p3067_p12  ;;  %p3074_p5 = por %p3073_p2, %p3072_p0 }
  0x4c   : > { %p3075_p8 = pnand %p3074_p5, %p3068_p13 }
  0x4e   : > { %3078 = shalt.err (!%p3075_p8)
}
  0x4f   : > { %s3922_s6 = sld [smem:[#allocation38_spill]]  ;;  %s3090_s22 = scalar_lea.vmem %s573_s18, 4096 }
  0x50   : > { %p3091_p9 = scmp.ne.s32.totalorder %s573_s18, %s3090_s22  ;;  %p3098_p12 = scmp.lt.s32.totalorder %s573_s18, %s573_s18 }
  0x51   : > { %p3099_p0 = scmp.lt.s32.totalorder %s3090_s22, %s3090_s22 }
  0x52   : > { %p3093_p10 = pnand %p3091_p9, %p3468_p7 }
  0x53   : > { %p3100_p13 = por %p3099_p0, %p3098_p12 }
  0x54   : > { %p3094_p11 = pneg %p3093_p10 }
  0x55   : > { %2757 = dma.hbm_to_vmem [thread:$0]  (!%p3458_p6), %s3922_s6, 1024, %s535_s26, [#allocation10], %s3891_s1, %s3891_s1, %s3307_s24  }
  0x56   : > { %p3101_p2 = pnand %p3100_p13, %p3094_p11 }
  0x58   : > { %3104 = shalt.err (!%p3101_p2)
}
  0x59   : > { %s3310_s25 = smov 256   ;;  %s3311_s29 = smov 16  }
  0x5a   : > { %s3923_s12 = sld [smem:[#allocation40_spill]]  ;;  %s3312_s26 = smov [#allocation15]  }
  0x5b   : > { %s588_s16 = sshll.u32 %s3312_s26, 4  ;;  %s589_s16 = int_to_ptr.vmem [resolvable:$true] %s588_s16 }
  0x5c   : > { %s3116_s1 = scalar_lea.vmem %s589_s16, 4096  ;;  %p3124_p10 = scmp.lt.s32.totalorder %s589_s16, %s589_s16 }
  0x5d   : > { %p3117_p5 = scmp.ne.s32.totalorder %s589_s16, %s3116_s1  ;;  %p3125_p11 = scmp.lt.s32.totalorder %s3116_s1, %s3116_s1 }
  0x5f   : > { %p3119_p8 = pnand %p3117_p5, %p3468_p7  ;;  %p3126_p12 = por %p3125_p11, %p3124_p10 }
  0x60   : > { %2763 = dma.hbm_to_vmem [thread:$0]  (!%p3458_p6), %s3923_s12, 4096, %s573_s18, [#allocation13], %s3310_s25, %s3310_s25, %s3311_s29  }
  0x61   : > { %p3120_p9 = pneg %p3119_p8 }
  0x63   : > { %p3127_p0 = pnand %p3126_p12, %p3120_p9 }
  0x65   : > { %3130 = shalt.err (!%p3127_p0)
}
  0x66   : > { %s3924_s22 = smov 64   ;;  %s3925_s14 = sld [smem:[#allocation41_spill]] }
  0x67   : > { %s2381_s3 = sadd.s32 4294967294, %s3301_s21   ;;  %s3541_s28 = sadd.s32 1, %s3301_s21  }
  0x68   : > { %3926 = sst [smem:[#allocation30_spill]] %s3541_s28  ;;  %s49_s1 = ssub.s32 %s3301_s21, %s3541_s28 }
  0x69   : > { %s52_s25 = sadd.s32 1, %s3297_s20  ;;  %p50_p7 = scmp.eq.s32.totalorder %s49_s1, 0 }
  0x6a   : > { %p59_p13 = scmp.ne.s32.totalorder %s3297_s20, %s3293_s30  ;;  %p60_p2 = scmp.eq.s32.totalorder %s3301_s21, 0 }
  0x6b   : > { %p65_p5 = scmp.ne.s32.totalorder %s3293_s30, %s3289_s0  ;;  %p451_p9 = scmp.eq.s32.totalorder %s3444_s2, 1 }
  0x6c   : > { %2766 = dma.hbm_to_vmem [thread:$0]  (!%p3458_p6), %s3925_s14, 4096, %s589_s16, [#allocation16], %s3924_s22, %s3924_s22, %s3307_s24  }
  0x6d   : > { %s3552_s29 = scalar_select %p50_p7, %s3297_s20, %s52_s25  }
  0x6e   : > { %p3554_p8 = por %p60_p2, %p59_p13  ;;  %p3560_p6 = por %p3893_p1, %p65_p5 }
  0x6f   : > { %3927 = sst [smem:[#allocation31_spill]] %s3552_s29  ;;  %p457_p10 = scmp.eq.s32.totalorder %s2381_s3, 1 }
  0x70   : > { %s3929_s24 = scalar_select %p3560_p6, 1, 0 }
  0x71   : > { %p2787_p11 = scmp.lt.s32.totalorder %s3301_s21, 2  ;;  %s3567_s26 = sand.u32 1, %s3297_s20  }
  0x72   : > { %p3569_p12 = por %p451_p9, %p59_p13  ;;  %p3573_p0 = por %p457_p10, %p65_p5 }
  0x73   : > { %s2390_s17 = sshll.u32 %s3567_s26, 3  ;;  %s2391_s18 = sshll.u32 %s3301_s21, 7 }
  0x74   : > { %s3930_s16 = scalar_select %p3569_p12, 1, 0 }
  0x75   : > { %s3931_s22 = scalar_select %p3573_p0, 1, 0 }
  0x76   : > { %s3933_s4 = sld [smem:[#allocation33_spill]]  ;;  %s615_s3 = scalar_lea.vmem [#allocation3], %s2390_s17 }
  0x77   : > { %3932 = sst [smem:[#allocation32_spill]] %s3931_s22  ;;  %s622_s8 = sshll.u32 %s615_s3, 4  ;;  %s3584_s8 = int_to_ptr.vmem [resolvable:$true] %s622_s8 }
  0x78   : > { %p3588_p7 = pnand %p2787_p11, %p3554_p8  ;;  %s612_s29 = scalar_lea.sflag [#allocation4], %s3567_s26 }
  0x7a   : > { %p3133_p2 = pneg %p3588_p7 }
  0x7c   : > { %s3582_s6 = scalar_lea.hbm %s3933_s4, %s2391_s18  ;;  %s3136_s27 = scalar_lea.hbm %s3933_s4, 256 }
  0x7d   : > { %s3131_s20 = scalar_lea.hbm %s3582_s6, 128  ;;  %p3137_p8 = scmp.lt.s32.totalorder %s3582_s6, %s3933_s4 }
  0x7e   : > { %p3132_p13 = scmp.ne.s32.totalorder %s3582_s6, %s3131_s20  ;;  %p3138_p10 = scmp.lt.s32.totalorder %s3136_s27, %s3131_s20 }
  0x80   : > { %p3134_p5 = pnand %p3133_p2, %p3132_p13  ;;  %p3139_p11 = por %p3138_p10, %p3137_p8 }
  0x82   : > { %p3135_p9 = pneg %p3134_p5 }
  0x84   : > { %p3140_p4 = pnand %p3139_p11, %p3135_p9 }
  0x86   : > { %3143 = shalt.err (!%p3140_p4)
}
  0x87   : > { %s3144_s3 = scalar_lea.vmem %s3584_s8, 128  ;;  %s3313_s17 = smov [#allocation3]  }
  0x88   : > { %p3145_p1 = scmp.ne.s32.totalorder %s3584_s8, %s3144_s3  ;;  %s3149_s18 = sshll.u32 %s3313_s17, 4  ;;  %s3150_s18 = int_to_ptr.vmem [resolvable:$false] %s3149_s18 }
  0x89   : > { %s3151_s14 = scalar_lea.vmem %s3150_s18, 256  ;;  %p3152_p0 = scmp.lt.s32.totalorder %s3584_s8, %s3150_s18 }
  0x8a   : > { %p3147_p13 = pnand %p3145_p1, %p3133_p2  ;;  %p3153_p12 = scmp.lt.s32.totalorder %s3151_s14, %s3144_s3 }
  0x8c   : > { %p3148_p5 = pneg %p3147_p13  ;;  %p3154_p6 = por %p3153_p12, %p3152_p0 }
  0x8e   : > { %p3155_p8 = pnand %p3154_p6, %p3148_p5 }
  0x90   : > { %3158 = shalt.err (!%p3155_p8)
}
  0x91   : > { %2770 = dma.hbm_to_vmem [thread:$0]  (!%p3588_p7), %s3582_s6, 128, %s3584_s8, %s612_s29  }
  0x92   : > { %s2392_s20 = sshll.u32 %s3301_s21, 4  ;;  %s632_s27 = scalar_lea.vmem [#allocation6], %s3567_s26 }
  0x93   : > { %s639_s1 = sshll.u32 %s632_s27, 4  ;;  %s3935_s4 = sld [smem:[#allocation34_spill]]  ;;  %s640_s1 = int_to_ptr.vmem [resolvable:$true] %s639_s1 }
  0x94   : > { %s3936_s14 = sand.u32 1, %s3301_s21  }
  0x95   : > { %s630_s3 = scalar_lea.sflag [#allocation7], %s3936_s14 }
  0x99   : > { %s637_s18 = scalar_lea.hbm %s3935_s4, %s2392_s20  ;;  %s3164_s6 = scalar_lea.hbm %s3935_s4, 32 }
  0x9a   : > { %s3159_s28 = scalar_lea.hbm %s637_s18, 16  ;;  %p3165_p12 = scmp.lt.s32.totalorder %s637_s18, %s3935_s4 }
  0x9b   : > { %p3160_p1 = scmp.ne.s32.totalorder %s637_s18, %s3159_s28  ;;  %p3166_p0 = scmp.lt.s32.totalorder %s3164_s6, %s3159_s28 }
  0x9d   : > { %p3162_p4 = pnand %p3160_p1, %p3133_p2  ;;  %p3167_p9 = por %p3166_p0, %p3165_p12 }
  0x9f   : > { %p3163_p6 = pneg %p3162_p4 }
  0xa1   : > { %p3168_p10 = pnand %p3167_p9, %p3163_p6 }
  0xa3   : > { %3171 = shalt.err (!%p3168_p10)
}
  0xa4   : > { %s3172_s26 = scalar_lea.vmem %s640_s1, 16  ;;  %s3314_s20 = smov [#allocation6]  }
  0xa5   : > { %p3173_p11 = scmp.ne.s32.totalorder %s640_s1, %s3172_s26  ;;  %s3177_s27 = sshll.u32 %s3314_s20, 4  ;;  %s3178_s27 = int_to_ptr.vmem [resolvable:$false] %s3177_s27 }
  0xa6   : > { %s3179_s0 = scalar_lea.vmem %s3178_s27, 32  ;;  %p3180_p8 = scmp.lt.s32.totalorder %s640_s1, %s3178_s27 }
  0xa7   : > { %p3175_p13 = pnand %p3173_p11, %p3133_p2  ;;  %p3181_p1 = scmp.lt.s32.totalorder %s3179_s0, %s3172_s26 }
  0xa9   : > { %p3176_p5 = pneg %p3175_p13  ;;  %p3182_p4 = por %p3181_p1, %p3180_p8 }
  0xab   : > { %p3183_p3 = pnand %p3182_p4, %p3176_p5 }
  0xad   : > { %3186 = shalt.err (!%p3183_p3)
}
  0xae   : > { %2773 = dma.hbm_to_vmem [thread:$0]  (!%p3588_p7), %s637_s18, 16, %s640_s1, %s630_s3  }
  0xaf   : > { %p3937_p6 = scmp.ne.s32.totalorder %s3916_s23, 0 }
  0xb0   : > { %s3642_s28 = sand.u32 (!%p3937_p6), 1, %s3293_s30   ;;  %p3938_p2 = scmp.ne.s32.totalorder (!%p3937_p6), %s3929_s24, 0 }
  0xb1   : > { %648 = sbr.rel (%p3937_p6) target bundleno = 3029 (0xbd5), region = 92  ;;  %s2394_s22 = sshll.u32 (!%p3937_p6), %s3642_s28, 3 }
  0xb2   : > { %s651_s25 = scalar_lea.sflag (!%p3937_p6), [#allocation4], %s3642_s28  ;;  %s3648_s17 = scalar_lea.vmem (!%p3937_p6), [#allocation3], %s2394_s22 }
  0xb6   : > { %3256 = dma.done.wait (%p3938_p2), %s651_s25, 128  }
  0xb7   : > { %3258 = vsyncadd (%p3938_p2), %s651_s25, 4294967168  ;;  %s659_s12 = sand.u32 1, %s3444_s2   ;;  %s662_s1 = scalar_lea.vmem [#allocation6], %s3642_s28 }
  0xb8   : > { %s660_s23 = scalar_lea.sflag [#allocation7], %s659_s12 }
  0xb9   : > { %3260 = dma.done.wait (%p3938_p2), %s660_s23, 16  }
  0xba   : > { %3262 = vsyncadd (%p3938_p2), %s660_s23, 4294967280  ;;  %p3939_p3 = scmp.eq.s32.totalorder %s3444_s2, 0 }
  0xbc   : > { %3264 = dma.done.wait (%p3939_p3), [#allocation7], 1024   ;;  %p3940_p7 = pmov %p3939_p3 }
  0xbd   : > { %p3941_p12 = pmov %p3939_p3 }
  0xbe   : > { %3266 = vsyncadd (%p3940_p7), [#allocation7], 4294966272 }
  0xbf   : > { %3268 = dma.done.wait (%p3941_p12), [#allocation10], 2048   ;;  %p3942_p0 = pmov %p3939_p3 }
  0xc1   : > { %3270 = vsyncadd (%p3942_p0), [#allocation10], 4294965248  ;;  %p3943_p9 = pmov %p3942_p0 }
  0xc2   : > { %p3944_p10 = pmov %p3942_p0 }
  0xc3   : > { %3272 = dma.done.wait (%p3943_p9), [#allocation13], 5120  }
  0xc4   : > { %3274 = vsyncadd (%p3944_p10), [#allocation13], 4294962176  ;;  %p3945_p11 = pmov %p3942_p0 }
  0xc5   : > { %p3946_p13 = pmov %p3942_p0 }
  0xc6   : > { %3276 = dma.done.wait (%p3945_p11), [#allocation16], 4096  }
  0xc7   : > { %3278 = vsyncadd (%p3946_p13), [#allocation16], 4294963200  ;;  %v3315_v0 = vmov 0.0   ;;  %vm3316_vm0 = vmmov 0   ;;  %v2843_v1 = vld [vmem:[#allocation9 + $0x38] sm:$0xff]   ;;  %v2845_v3 = vld [vmem:[#allocation9 + $0x30] sm:$0xff]  }
  0xc8   : > { %2632 = vmatprep.subr.bf16.mxu1 %v3315_v0  ;;  %2612 = vmatprep.subr.bf16.mxu0 %v3315_v0  ;;  %v2844_v2 = vld [vmem:[#allocation8 + $0x38] sm:$0xff]   ;;  %v2846_v4 = vld [vmem:[#allocation8 + $0x30] sm:$0xff]   ;;  %v2847_v5 = vld [vmem:[#allocation9 + $0x28] sm:$0xff]   ;;  %s3947_s6 = sld [smem:[#allocation36_spill]]  ;;  %vm1097_vm1 = vcmask 523264   ;;  %s3317_s8 = smov 64  }
  0xc9   : > { %2648 = vmatprep.mubr.msk.bf16.mxu1 %vm3316_vm0, %v3315_v0  ;;  %2628 = vmatprep.mubr.msk.bf16.mxu0 %vm3316_vm0, %v3315_v0  ;;  %v2848_v6 = vld [vmem:[#allocation8 + $0x28] sm:$0xff]   ;;  %v2849_v7 = vld [vmem:[#allocation9 + $0x20] sm:$0xff]   ;;  %v2851_v9 = vld [vmem:[#allocation9 + $0x18] sm:$0xff]   ;;  %vm1144_vm2 = vcmask 64512   ;;  %vm1161_vm3 = vcmask 1043456   ;;  %s2402_s20 = sshll.u32 %s3642_s28, 4 }
  0xca   : > { %2633 = vmatpush3.bf16.msra.mxu1 %v2843_v1  ;;  %2613 = vmatpush3.bf16.msra.mxu0 %v2844_v2  ;;  %v2850_v8 = vld [vmem:[#allocation8 + $0x20] sm:$0xff]   ;;  %v2852_v10 = vld [vmem:[#allocation8 + $0x18] sm:$0xff]   ;;  %v2853_v11 = vld [vmem:[#allocation9 + $0x10] sm:$0xff]   ;;  %s3740_s27 = scalar_lea.vmem [#allocation18], %s2402_s20  ;;  %vm1206_vm4 = vcmask 519168   ;;  %vm1330_vm5 = vcmask 1043968  }
  0xcb   : > { %2634 = vmatprep.subr.bf16.mxu1 %v3315_v0  ;;  %2614 = vmatprep.subr.bf16.mxu0 %v3315_v0  ;;  %v2854_v12 = vld [vmem:[#allocation8 + $0x10] sm:$0xff]   ;;  %v2855_v13 = vld [vmem:[#allocation9 + $0x8] sm:$0xff]   ;;  %v2857_v15 = vld [vmem:[#allocation9] sm:$0xff]   ;;  %s2173_s0 = scalar_lea.sflag [#allocation19], %s3642_s28  ;;  %p3948_p8 = scmp.ne.s32.totalorder %s3930_s16, 0 }
  0xcc   : > { %v2856_v14 = vld [vmem:[#allocation8 + $0x8] sm:$0xff]   ;;  %v2858_v17 = vld [vmem:[#allocation8] sm:$0xff]   ;;  %v2859_v35 = vld [vmem:[#allocation11 + $0x38] sm:$0xff]  }
  0xcd   : > { %v3695_v16 = vld [vmem:[%s3648_s17] sm:$0xff]  ;;  %v2412_v19 = vld [vmem:[%s3873_s5] ss:$0 sm:$0xff]  ;;  %v2862_v38 = vld [vmem:[#allocation11 + $0x20] sm:$0xff]   ;;  %s3319_s17 = smov [#allocation18]  }
  0xce   : > { %2635 = vmatpush3.bf16.msra.mxu1 %v2845_v3  ;;  %2615 = vmatpush3.bf16.msra.mxu0 %v2846_v4  ;;  %v752_v18 = vpack.c.bf16 %v3695_v16, %v3695_v16  ;;  %v2403_v20 = vld [vmem:[%s3947_s6] ss:$0 sm:$0xff]  ;;  %v2860_v36 = vld [vmem:[#allocation11 + $0x30] sm:$0xff]   ;;  %v2863_v39 = vld [vmem:[#allocation11 + $0x18] sm:$0xff]   ;;  %s2523_s6 = sshll.u32 %s3444_s2, 8  ;;  %s3191_s12 = sshll.u32 %s3319_s17, 4  ;;  %s3192_s12 = int_to_ptr.vmem [resolvable:$false] %s3191_s12 }
  0xcf   : > { %2636 = vmatprep.subr.bf16.mxu1 %v3315_v0  ;;  %2616 = vmatprep.subr.bf16.mxu0 %v3315_v0  ;;  %v2861_v37 = vld [vmem:[#allocation11 + $0x28] sm:$0xff]   ;;  %v2864_v40 = vld [vmem:[#allocation11 + $0x10] sm:$0xff]   ;;  %v2866_v42 = vld [vmem:[#allocation11] sm:$0xff]   ;;  %s3798_s20 = scalar_lea.hbm %s3887_s19, %s2523_s6 }
  0xd0   : > { %v2865_v41 = vld [vmem:[#allocation11 + $0x8] sm:$0xff]  }
  0xd1   : > { %v2430_v43 = vld [vmem:[%s662_s1] ss:$0 sm:$0xff] }
  0xd2   : > { %2637 = vmatpush3.bf16.msra.mxu1 %v2847_v5  ;;  %2617 = vmatpush3.bf16.msra.mxu0 %v2848_v6  ;;  %v2421_v55 = vld [vmem:[%s3875_s7] ss:$0 sm:$0xff] }
  0xd3   : > { %2638 = vmatprep.subr.bf16.mxu1 %v3315_v0  ;;  %2618 = vmatprep.subr.bf16.mxu0 %v3315_v0 }
  0xd6   : > { %2639 = vmatpush3.bf16.msra.mxu1 %v2849_v7  ;;  %2619 = vmatpush3.bf16.msra.mxu0 %v2850_v8 }
  0xd7   : > { %2640 = vmatprep.subr.bf16.mxu1 %v3315_v0  ;;  %2620 = vmatprep.subr.bf16.mxu0 %v3315_v0 }
  0xda   : > { %2641 = vmatpush3.bf16.msra.mxu1 %v2851_v9  ;;  %2621 = vmatpush3.bf16.msra.mxu0 %v2852_v10 }
  0xdb   : > { %2642 = vmatprep.subr.bf16.mxu1 %v3315_v0  ;;  %2622 = vmatprep.subr.bf16.mxu0 %v3315_v0 }
  0xde   : > { %2643 = vmatpush3.bf16.msra.mxu1 %v2853_v11  ;;  %2623 = vmatpush3.bf16.msra.mxu0 %v2854_v12 }
  0xdf   : > { %2644 = vmatprep.subr.bf16.mxu1 %v3315_v0  ;;  %2624 = vmatprep.subr.bf16.mxu0 %v3315_v0 }
  0xe2   : > { %2645 = vmatpush3.bf16.msra.mxu1 %v2855_v13  ;;  %2625 = vmatpush3.bf16.msra.mxu0 %v2856_v14 }
  0xe3   : > { %2646 = vmatprep.subr.bf16.mxu1 %v3315_v0  ;;  %2626 = vmatprep.subr.bf16.mxu0 %v3315_v0 }
  0xe6   : > { %2647 = vmatpush3.bf16.msra.mxu1 %v2857_v15  ;;  %2627 = vmatpush3.bf16.msra.mxu0 %v2858_v17 }
  0xe7   : > { %2672 = vmatprep.subr.bf16.mxu1 %v3315_v0  ;;  %2652 = vmatprep.subr.bf16.mxu0 %v3315_v0 }
  0xe9   : > { %2649 = vmatmul.mubr.bf16.vlgmr.msra.gmra.mxu1 %v752_v18  ;;  %2629 = vmatmul.mubr.bf16.vlgmr.msra.gmra.mxu0 %v752_v18 }
  0xea   : > { %2674 = vmatprep.mubr.msk.bf16.mxu1 %vm3316_vm0, %v3315_v0  ;;  %2668 = vmatprep.mubr.msk.bf16.mxu0 %vm3316_vm0, %v3315_v0 }
  0xeb   : > { %2653 = vmatpush3.bf16.msra.mxu0 %v2859_v35  ;;  %v2872_v35 = vld [vmem:[#allocation12 + $0x10] sm:$0xff]  }
  0xec   : > { %2654 = vmatprep.subr.bf16.mxu0 %v3315_v0 }
  0xef   : > { %2655 = vmatpush3.bf16.msra.mxu0 %v2860_v36  ;;  %v2873_v36 = vld [vmem:[#allocation12 + $0x8] sm:$0xff]  }
  0xf0   : > { %2656 = vmatprep.subr.bf16.mxu0 %v3315_v0 }
  0xf3   : > { %2657 = vmatpush3.bf16.msra.mxu0 %v2861_v37  ;;  %v2874_v37 = vld [vmem:[#allocation12] sm:$0xff]  }
  0xf4   : > { %2658 = vmatprep.subr.bf16.mxu0 %v3315_v0 }
  0xf7   : > { %2659 = vmatpush3.bf16.msra.mxu0 %v2862_v38 }
  0xf8   : > { %2660 = vmatprep.subr.bf16.mxu0 %v3315_v0 }
  0xfb   : > { %2661 = vmatpush3.bf16.msra.mxu0 %v2863_v39 }
  0xfc   : > { %2662 = vmatprep.subr.bf16.mxu0 %v3315_v0 }
  0xff   : > { %2663 = vmatpush3.bf16.msra.mxu0 %v2864_v40 }
 0x100   : > { %2664 = vmatprep.subr.bf16.mxu0 %v3315_v0 }
 0x103   : > { %2665 = vmatpush3.bf16.msra.mxu0 %v2865_v41 }
 0x104   : > { %2666 = vmatprep.subr.bf16.mxu0 %v3315_v0 }
 0x107   : > { %2667 = vmatpush3.bf16.msra.mxu0 %v2866_v42 }
 0x108   : > { %2696 = vmatprep.subr.bf16.mxu0 %v3315_v0 }
 0x10a   : > { %2669 = vmatmul.mubr.bf16.vlgmr.msra.gmra.mxu0 %v752_v18 }
 0x10b   : > { %2712 = vmatprep.mubr.msk.bf16.mxu0 %vm3316_vm0, %v3315_v0 }
 0x1a9   : > { %v970_v21 = vpop.f32.mrf.mxu1  ;;  %v859_v23 = vpop.f32.mrf.mxu0 }
 0x1aa   : > { %v971_v22 = vadd.f32 %v2412_v19, %v970_v21  ;;  %v860_v24 = vadd.f32 %v2403_v20, %v859_v23 }
 0x1ab   : > { %v2650_v25 = vpop.f32.mrf.mxu1  ;;  %v2630_v27 = vpop.f32.mrf.mxu0 }
 0x1ac   : > { %v1095_v26 = vpack.c.bf16 %v971_v22, %v971_v22  ;;  %v1087_v28 = vmul.f32 0.125, %v860_v24 }
 0x1ad   : > { %v973_v29 = vpop.f32.mrf.mxu1  ;;  %v862_v31 = vpop.f32.mrf.mxu0 }
 0x1ae   : > { %v1102_v30 = vsel %vm1097_vm1, %v1095_v26, 0  ;;  %1212 = vrot.lane.b32.xlu1 %v1095_v26, %s3317_s8  ;;  %v1094_v32 = vpack.c.bf16 %v1087_v28, %v1087_v28  ;;  %v2868_v31 = vld [vmem:[#allocation12 + $0x30] sm:$0xff]  }
 0x1af   : > { %v2651_v33 = vpop.f32.mrf.mxu1  ;;  %2673 = vmatpush3.bf16.xpose.msra.mxu1 %v1102_v30  ;;  %v2631_v34 = vpop.f32.mrf.mxu0  ;;  %v2867_v30 = vld [vmem:[#allocation12 + $0x38] sm:$0xff]  }
 0x1b0   : > { %2678 = vmatprep.subr.bf16.mxu1 %v3315_v0  ;;  %2697 = vmatpush3.bf16.msra.mxu0 %v2867_v30  ;;  %v2870_v33 = vld [vmem:[#allocation12 + $0x20] sm:$0xff]   ;;  %v2871_v34 = vld [vmem:[#allocation12 + $0x18] sm:$0xff]  }
 0x1b1   : > { %2698 = vmatprep.subr.bf16.mxu0 %v3315_v0 }
 0x1b2   : > { %1209 = vrot.lane.b32.xlu1 %v1094_v32, %s3317_s8 }
 0x1b4   : > { %2699 = vmatpush3.bf16.msra.mxu0 %v2868_v31  ;;  %v2446_v31 = vld [vmem:[%s3878_s10] ss:$0 sm:$0xff] }
 0x1b5   : > { %2700 = vmatprep.subr.bf16.mxu0 %v3315_v0 }
 0x1b6   : > { %2675 = vmatmul.mubr.msk.bf16.vlgmr.msra.gmra.mxu1 %vm1097_vm1, %v1094_v32  ;;  %v2869_v32 = vld [vmem:[#allocation12 + $0x28] sm:$0xff]  }
 0x1b7   : > { %2680 = vmatprep.mubr.msk.bf16.mxu1 %vm3316_vm0, %v3315_v0 }
 0x1b8   : > { %2701 = vmatpush3.bf16.msra.mxu0 %v2869_v32 }
 0x1b9   : > { %2702 = vmatprep.subr.bf16.mxu0 %v3315_v0 }
 0x1bc   : > { %2703 = vmatpush3.bf16.msra.mxu0 %v2870_v33  ;;  %v2447_v33 = vld [vmem:[%s3879_s11] ss:$0 sm:$0xff] }
 0x1bd   : > { %2704 = vmatprep.subr.bf16.mxu0 %v3315_v0 }
 0x1c0   : > { %2705 = vmatpush3.bf16.msra.mxu0 %v2871_v34 }
 0x1c1   : > { %2706 = vmatprep.subr.bf16.mxu0 %v3315_v0 }
 0x1c4   : > { %2707 = vmatpush3.bf16.msra.mxu0 %v2872_v35 }
 0x1c5   : > { %2708 = vmatprep.subr.bf16.mxu0 %v3315_v0 }
 0x1c8   : > { %2709 = vmatpush3.bf16.msra.mxu0 %v2873_v36  ;;  %v2925_v36 = vld [vmem:[#allocation15 + $0x38] sm:$0xff]  }
 0x1c9   : > { %2710 = vmatprep.subr.bf16.mxu0 %v3315_v0 }
 0x1ca   : > { %v1081_v56 = vpop.f32.mrf.mxu0 }
 0x1cb   : > { %v1082_v57 = vadd.f32 %v2421_v55, %v1081_v56  ;;  %v2883_v55 = vld [vmem:[#allocation14 + $0xc4] ss:$16 sps:$4 sm:$0xff]   ;;  %v2886_v56 = vld [vmem:[#allocation14 + $0xcc] ss:$16 sps:$4 sm:$0xff]  }
 0x1cc   : > { %v2670_v58 = vpop.f32.mrf.mxu0  ;;  %2711 = vmatpush3.bf16.msra.mxu0 %v2874_v37  ;;  %v2926_v37 = vld [vmem:[#allocation15 + $0xb8] sm:$0xff]  }
 0x1cd   : > { %v1096_v59 = vpack.c.bf16 %v1082_v57, %v1082_v57  ;;  %v2881_v57 = vld [vmem:[#allocation14 + $0xc0] ss:$16 sps:$4 sm:$0xff]   ;;  %v2884_v58 = vld [vmem:[#allocation14 + $0xc8] ss:$16 sps:$4 sm:$0xff]  }
 0x1ce   : > { %v1084_v60 = vpop.f32.mrf.mxu0 }
 0x1cf   : > { %v1163_v61 = vsel %vm1161_vm3, %v1096_v59, 0 }
 0x1d0   : > { %v2671_v62 = vpop.f32.mrf.mxu0  ;;  %2679 = vmatpush3.bf16.msra.mxu1 %v1163_v61 }
 0x1d1   : > { %2684 = vmatprep.subr.bf16.mxu1 %v3315_v0  ;;  %v2889_v62 = vld [vmem:[#allocation14 + $0xa4] ss:$16 sps:$4 sm:$0xff]  }
 0x220   : > { %v1213_v3 = vpop.permute.xlu1 %1212 }
 0x221   : > { %v1218_v5 = vsel %vm1097_vm1, %v1213_v3, 0  ;;  %v2893_v3 = vld [vmem:[#allocation14 + $0x80] ss:$16 sps:$4 sm:$0xff]  }
 0x224   : > { %v1210_v6 = vpop.permute.xlu1 %1209 }
 0x276   : > { %v1138_v44 = vpop.f32.mrf.mxu1 }
 0x277   : > { %v1139_v45 = vadd.f32 %v2430_v43, %v1138_v44 }
 0x278   : > { %v2676_v46 = vpop.f32.mrf.mxu1 }
 0x279   : > { %v1145_v47 = vsel %vm1144_vm2, %v1139_v45, -inf }
 0x27a   : > { %1146 = vmax.xlane.f32.xlu0 %v1145_v47  ;;  %v1141_v48 = vpop.f32.mrf.mxu1 }
 0x27c   : > { %v2677_v49 = vpop.f32.mrf.mxu1 }
 0x303   : > { %v1147_v50 = vpop.xlane.xlu0 %1146 }
 0x304   : > { %v1148_v51 = vsub.f32 %v1139_v45, %v1147_v50  ;;  %v2437_v45 = vld [vmem:[%s3877_s9] ss:$0 sm:$0xff] }
 0x306   : > { %v1149_v52 = vmul.f32 1.442695, %v1148_v51  ;;  %v2875_v51 = vld [vmem:[#allocation14 + $0xe0] ss:$16 sps:$4 sm:$0xff]  }
 0x308   : > { %2955 = vpow2.f32 %v1149_v52  ;;  %v2877_v52 = vld [vmem:[#allocation14 + $0xe4] ss:$16 sps:$4 sm:$0xff]  }
 0x315   : > { %v2956_v53 = vpop.eup %2955 }
 0x316   : > { %v1151_v54 = vsel %vm1144_vm2, %v2956_v53, 0.0 }
 0x317   : > { %1152 = vadd.xlane.f32.xlu0 %v1151_v54  ;;  %v2880_v54 = vld [vmem:[#allocation14 + $0xec] ss:$16 sps:$4 sm:$0xff]  }
 0x318   : > { %1729 = vmatprep.subr.bf16.mxu0 %v2880_v54  ;;  %v2943_v54 = vld [vmem:[#allocation15 + $0x50] sm:$0xff]  }
 0x3a0   : > { %v1153_v63 = vpop.xlane.xlu0 %1152 }
 0x3a1   : > { %2957 = vrcp.f32 %v1153_v63  ;;  %v2892_v63 = vld [vmem:[#allocation14 + $0xac] ss:$16 sps:$4 sm:$0xff]  }
 0x3ae   : > { %v2958_v1 = vpop.eup %2957 }
 0x3af   : > { %v1155_v2 = vmul.f32 %v2958_v1, %v2956_v53  ;;  %v2878_v53 = vld [vmem:[#allocation14 + $0xe8] ss:$16 sps:$4 sm:$0xff]   ;;  %v2887_v1 = vld [vmem:[#allocation14 + $0xa0] ss:$16 sps:$4 sm:$0xff]  }
 0x3b1   : > { %v1157_v4 = vpack.c.bf16 %v1155_v2, %v1155_v2  ;;  %1156 = vst.msk [vmem:[%s3740_s27] sm:$0xff] %vm1144_vm2, %v1155_v2  ;;  %v2890_v2 = vld [vmem:[#allocation14 + $0xa8] ss:$16 sps:$4 sm:$0xff]  }
 0x3b3   : > { %2681 = vmatmul.mubr.msk.bf16.vlgmr.msra.gmra.mxu1 %vm1144_vm2, %v1157_v4  ;;  %v2895_v4 = vld [vmem:[#allocation14 + $0x84] ss:$16 sps:$4 sm:$0xff]  }
 0x3b4   : > { %2685 = vmatpush3.bf16.xpose.msra.mxu1 %v1218_v5  ;;  %2686 = vmatprep.mubr.msk.bf16.mxu1 %vm3316_vm0, %v3315_v0  ;;  %v2896_v5 = vld [vmem:[#allocation14 + $0x88] ss:$16 sps:$4 sm:$0xff]  }
 0x3b5   : > { %2690 = vmatprep.subr.bf16.mxu1 %v3315_v0 }
 0x3bb   : > { %2687 = vmatmul.mubr.msk.bf16.vlgmr.msra.gmra.mxu1 %vm1097_vm1, %v1210_v6  ;;  %v2898_v6 = vld [vmem:[#allocation14 + $0x8c] ss:$16 sps:$4 sm:$0xff]  }
 0x3bc   : > { %2692 = vmatprep.mubr.msk.bf16.mxu1 %vm3316_vm0, %v3315_v0 }
 0x473   : > { %v1199_v7 = vpop.f32.mrf.mxu1 }
 0x474   : > { %v1205_v8 = vpack.c.bf16 %v1199_v7, %v1199_v7  ;;  %v2901_v7 = vld [vmem:[#allocation14 + $0x64] ss:$16 sps:$4 sm:$0xff]  }
 0x475   : > { %v2682_v9 = vpop.f32.mrf.mxu1 }
 0x476   : > { %1207 = vst.msk [vmem:[#allocation2] sm:$0xf] %vm1206_vm4, %v1205_v8  ;;  %v2904_v8 = vld [vmem:[#allocation14 + $0x6c] ss:$16 sps:$4 sm:$0xff]   ;;  %v2899_v9 = vld [vmem:[#allocation14 + $0x60] ss:$16 sps:$4 sm:$0xff]  }
 0x477   : > { %v1202_v10 = vpop.f32.mrf.mxu1 }
 0x478   : > { %v2902_v10 = vld [vmem:[#allocation14 + $0x68] ss:$16 sps:$4 sm:$0xff]  }
 0x479   : > { %v2683_v11 = vpop.f32.mrf.mxu1 }
 0x47a   : > { %v2907_v11 = vld [vmem:[#allocation14 + $0x44] ss:$16 sps:$4 sm:$0xff]  }
 0x47b   : > { %v1254_v12 = vpop.f32.mrf.mxu1 }
 0x47c   : > { %v1255_v13 = vadd.f32 %v2430_v43, %v1254_v12  ;;  %v2910_v12 = vld [vmem:[#allocation14 + $0x4c] ss:$16 sps:$4 sm:$0xff]  }
 0x47d   : > { %v2688_v14 = vpop.f32.mrf.mxu1 }
 0x47e   : > { %v1260_v15 = vsel %vm1144_vm2, %v1255_v13, -inf  ;;  %v2905_v14 = vld [vmem:[#allocation14 + $0x40] ss:$16 sps:$4 sm:$0xff]  }
 0x47f   : > { %1261 = vmax.xlane.f32.xlu0 %v1260_v15  ;;  %v1257_v17 = vpop.f32.mrf.mxu1  ;;  %v2908_v15 = vld [vmem:[#allocation14 + $0x48] ss:$16 sps:$4 sm:$0xff]  }
 0x480   : > { %v2913_v17 = vld [vmem:[#allocation14 + $0x24] ss:$16 sps:$4 sm:$0xff]  }
 0x481   : > { %v2689_v18 = vpop.f32.mrf.mxu1 }
 0x482   : > { %v2916_v18 = vld [vmem:[#allocation14 + $0x2c] ss:$16 sps:$4 sm:$0xff]  }
 0x495   : > { %1275 = vrot.lane.b32.xlu0 %v1096_v59, %s3317_s8 }
 0x508   : > { %v1262_v19 = vpop.xlane.xlu0 %1261 }
 0x509   : > { %v1263_v20 = vsub.f32 %v1255_v13, %v1262_v19  ;;  %v3318_v13 = vmov 0   ;;  %v2911_v19 = vld [vmem:[#allocation14 + $0x20] ss:$16 sps:$4 sm:$0xff]  }
 0x50b   : > { %v1264_v21 = vmul.f32 1.442695, %v1263_v20  ;;  %v2914_v20 = vld [vmem:[#allocation14 + $0x28] ss:$16 sps:$4 sm:$0xff]  }
 0x50c   : > { %v1276_v22 = vpop.permute.xlu0 %1275 }
 0x50d   : > { %2959 = vpow2.f32 %v1264_v21  ;;  %v1281_v23 = vsel %vm1161_vm3, %v1276_v22, 0  ;;  %v2919_v21 = vld [vmem:[#allocation14 + $0x4] ss:$16 sps:$4 sm:$0xff]   ;;  %v2922_v22 = vld [vmem:[#allocation14 + $0xc] ss:$16 sps:$4 sm:$0xff]  }
 0x50e   : > { %2691 = vmatpush3.bf16.msra.mxu1 %v1281_v23  ;;  %v2917_v23 = vld [vmem:[#allocation14] ss:$16 sps:$4 sm:$0xff]  }
 0x50f   : > { %1688 = vmatprep.subr.bf16.mxu1 %v2877_v52  ;;  %v2941_v52 = vld [vmem:[#allocation15 + $0x18] sm:$0xff]  }
 0x51a   : > { %v2960_v24 = vpop.eup %2959 }
 0x51b   : > { %v1266_v25 = vsel %vm1144_vm2, %v2960_v24, 0.0 }
 0x51c   : > { %1267 = vadd.xlane.f32.xlu1 %v1266_v25  ;;  %v2923_v25 = vld [vmem:[#allocation15 + $0x78] sm:$0xff]  }
 0x5a5   : > { %v1268_v26 = vpop.xlane.xlu1 %1267 }
 0x5a6   : > { %2961 = vrcp.f32 %v1268_v26  ;;  %v2924_v26 = vld [vmem:[#allocation15 + $0xf8] sm:$0xff]  }
 0x5b3   : > { %v2962_v27 = vpop.eup %2961 }
 0x5b4   : > { %v1270_v28 = vmul.f32 %v2962_v27, %v2960_v24  ;;  %v2920_v24 = vld [vmem:[#allocation14 + $0x8] ss:$16 sps:$4 sm:$0xff]  }
 0x5b6   : > { %v1273_v29 = vpack.c.bf16 %v1270_v28, %v1270_v28  ;;  %2434 = vst.msk [vmem:[%s3740_s27 + $0x8] sm:$0xff] %vm1144_vm2, %v1270_v28 }
 0x5b8   : > { %2693 = vmatmul.mubr.msk.bf16.vlgmr.msra.gmra.mxu1 %vm1144_vm2, %v1273_v29 }
 0x5b9   : > { %1689 = vmatpush1.bf16.msra.mxu1 %v2875_v51  ;;  %1720 = vmatprep.mubr.bf16.mxu1 %v3318_v13  ;;  %v2940_v51 = vld [vmem:[#allocation15 + $0xd8] sm:$0xff]  }
 0x5ba   : > { %1690 = vmatprep.subr.bf16.mxu1 %v2883_v55  ;;  %v2944_v55 = vld [vmem:[#allocation15 + $0xd0] sm:$0xff]  }
 0x5bd   : > { %1691 = vmatpush1.bf16.msra.mxu1 %v2881_v57  ;;  %v2946_v57 = vld [vmem:[#allocation15 + $0x90] sm:$0xff]  }
 0x5be   : > { %1692 = vmatprep.subr.bf16.mxu1 %v2889_v62  ;;  %v2952_v62 = vld [vmem:[#allocation15 + $0xc0] sm:$0xff]  }
 0x5c1   : > { %1693 = vmatpush1.bf16.msra.mxu1 %v2887_v1  ;;  %v2954_v1 = vld [vmem:[#allocation15 + $0x80] sm:$0xff]  }
 0x5c2   : > { %1694 = vmatprep.subr.bf16.mxu1 %v2895_v4 }
 0x5c5   : > { %1695 = vmatpush1.bf16.msra.mxu1 %v2893_v3 }
 0x5c6   : > { %1696 = vmatprep.subr.bf16.mxu1 %v2901_v7 }
 0x5c9   : > { %1697 = vmatpush1.bf16.msra.mxu1 %v2899_v9 }
 0x5ca   : > { %1698 = vmatprep.subr.bf16.mxu1 %v2907_v11 }
 0x5cd   : > { %1699 = vmatpush1.bf16.msra.mxu1 %v2905_v14 }
 0x5ce   : > { %1700 = vmatprep.subr.bf16.mxu1 %v2913_v17 }
 0x5d1   : > { %1701 = vmatpush1.bf16.msra.mxu1 %v2911_v19 }
 0x5d2   : > { %1702 = vmatprep.subr.bf16.mxu1 %v2919_v21 }
 0x5d5   : > { %1703 = vmatpush1.bf16.msra.mxu1 %v2917_v23 }
 0x5d6   : > { %2568 = vmatprep.subr.bf16.mxu1 %v2923_v25 }
 0x678   : > { %v1317_v38 = vpop.f32.mrf.mxu1 }
 0x679   : > { %v2522_v39 = vpack.c.bf16 %v1317_v38, %v1317_v38 }
 0x67a   : > { %v2694_v40 = vpop.f32.mrf.mxu1 }
 0x67b   : > { %1327 = vrot.lane.b32.xlu0 %v2522_v39, %s3317_s8  ;;  %v2927_v39 = vld [vmem:[#allocation15 + $0x70] sm:$0xff]   ;;  %s2199_s8 = sshll.u32 %s3740_s27, 4  ;;  %s3193_s27 = scalar_lea.vmem %s3192_s12, 512  ;;  %s3800_s8 = int_to_ptr.vmem [resolvable:$true] %s2199_s8 }
 0x67c   : > { %v1320_v41 = vpop.f32.mrf.mxu1  ;;  %v2928_v40 = vld [vmem:[#allocation15 + $0xf0] sm:$0xff]   ;;  %s3187_s25 = scalar_lea.vmem %s3800_s8, 256  ;;  %p3194_p6 = scmp.lt.s32.totalorder %s3800_s8, %s3192_s12 }
 0x67d   : > { %v2929_v41 = vld [vmem:[#allocation15 + $0x30] sm:$0xff]   ;;  %p3188_p5 = scmp.ne.s32.totalorder %s3800_s8, %s3187_s25  ;;  %p3195_p2 = scmp.lt.s32.totalorder %s3193_s27, %s3187_s25 }
 0x67e   : > { %v2695_v42 = vpop.f32.mrf.mxu1 }
 0x67f   : > { %v2930_v42 = vld [vmem:[#allocation15 + $0xb0] sm:$0xff]   ;;  %p3189_p1 = pnand %p3188_p5, %p3948_p8  ;;  %p3196_p3 = por %p3195_p2, %p3194_p6 }
 0x681   : > { %p3190_p4 = pneg %p3189_p1 }
 0x683   : > { %p3197_p7 = pnand %p3196_p3, %p3190_p4 }
 0x6ed   : > { %v1328_v43 = vpop.permute.xlu0 %1327 }
 0x6ee   : > { %1331 = vst.msk [vmem:[#allocation2] sm:$0xf] %vm1330_vm5, %v1328_v43  ;;  %v2931_v43 = vld [vmem:[#allocation15 + $0x68] sm:$0xff]  }
 0x6f5   : > { %v1332_v44 = vld [vmem:[#allocation2] sm:$0xf] }
 0x6f6   : > { %2713 = vmatmul.mubr.bf16.vlgmr.msra.gmra.mxu0 %v1332_v44  ;;  %v2932_v44 = vld [vmem:[#allocation15 + $0xe8] sm:$0xff]  }
 0x6f7   : > { %1730 = vmatpush1.bf16.msra.mxu0 %v2878_v53  ;;  %1761 = vmatprep.mubr.bf16.mxu0 %v3318_v13  ;;  %v2942_v53 = vld [vmem:[#allocation15 + $0x98] sm:$0xff]  }
 0x6f8   : > { %1731 = vmatprep.subr.bf16.mxu0 %v2886_v56  ;;  %v2945_v56 = vld [vmem:[#allocation15 + $0x10] sm:$0xff]  }
 0x6fb   : > { %1732 = vmatpush1.bf16.msra.mxu0 %v2884_v58  ;;  %v2947_v58 = vld [vmem:[#allocation15 + $0x48] sm:$0xff]  }
 0x6fc   : > { %1733 = vmatprep.subr.bf16.mxu0 %v2892_v63  ;;  %v2953_v63 = vld [vmem:[#allocation15] sm:$0xff]  }
 0x6ff   : > { %1734 = vmatpush1.bf16.msra.mxu0 %v2890_v2  ;;  %v1508_v2 = vlaneseq }
 0x700   : > { %1735 = vmatprep.subr.bf16.mxu0 %v2898_v6  ;;  %v1506_v6 = vld [vmem:[%s3881_s13] sm:$0xf] }
 0x701   : > { %v1509_v3 = vshrl.u32 %v1508_v2, 7 }
 0x703   : > { %1736 = vmatpush1.bf16.msra.mxu0 %v2896_v5  ;;  %v1510_v4 = vsub.s32 0, %v1509_v3  ;;  %v1518_v5 = vsub.s32 2, %v1509_v3  ;;  %v1514_v7 = vsub.s32 1, %v1509_v3 }
 0x704   : > { %1737 = vmatprep.subr.bf16.mxu0 %v2904_v8  ;;  %v1522_v8 = vsub.s32 3, %v1509_v3 }
 0x705   : > { %v1511_v9 = vrot.slane %v1506_v6, %v1510_v4  ;;  %v1515_v13 = vrot.slane %v1506_v6, %v1514_v7 }
 0x706   : > { %v1523_v14 = vrot.slane %v1506_v6, %v1522_v8 }
 0x707   : > { %1738 = vmatpush1.bf16.msra.mxu0 %v2902_v10  ;;  %v1519_v10 = vrot.slane %v1506_v6, %v1518_v5 }
 0x708   : > { %1739 = vmatprep.subr.bf16.mxu0 %v2910_v12 }
 0x70b   : > { %1740 = vmatpush1.bf16.msra.mxu0 %v2908_v15 }
 0x70c   : > { %1741 = vmatprep.subr.bf16.mxu0 %v2916_v18 }
 0x70f   : > { %1742 = vmatpush1.bf16.msra.mxu0 %v2914_v20 }
 0x710   : > { %1743 = vmatprep.subr.bf16.mxu0 %v2922_v22 }
 0x713   : > { %1744 = vmatpush1.bf16.msra.mxu0 %v2920_v24 }
 0x714   : > { %2590 = vmatprep.subr.bf16.mxu0 %v2924_v26 }
 0x7b6   : > { %v1438_v46 = vpop.f32.mrf.mxu0 }
 0x7b7   : > { %v1439_v47 = vadd.f32 %v2437_v45, %v1438_v46  ;;  %v2933_v45 = vld [vmem:[#allocation15 + $0x28] sm:$0xff]  }
 0x7b8   : > { %v2714_v0 = vpop.f32.mrf.mxu0  ;;  %v2934_v46 = vld [vmem:[#allocation15 + $0xa8] sm:$0xff]  }
 0x7b9   : > { %v1444_v48 = vadd.f32 %v1439_v47, %v3695_v16  ;;  %v2935_v47 = vld [vmem:[#allocation15 + $0x60] sm:$0xff]  }
 0x7ba   : > { %v1441_v49 = vpop.f32.mrf.mxu0  ;;  %v2936_v0 = vld [vmem:[#allocation15 + $0xe0] sm:$0xff]  }
 0x7bb   : > { %1447 = vadd.xlane.f32.xlu0 %v1444_v48  ;;  %v2938_v49 = vld [vmem:[#allocation15 + $0xa0] sm:$0xff]  }
 0x7bc   : > { %v2715_v50 = vpop.f32.mrf.mxu0 }
 0x7bd   : > { %v2939_v50 = vld [vmem:[#allocation15 + $0x58] sm:$0xff]  }
 0x844   : > { %v1448_v16 = vpop.xlane.xlu0 %1447 }
 0x845   : > { %v1450_v59 = vmul.f32 0.0078125, %v1448_v16  ;;  %v2948_v16 = vld [vmem:[#allocation15 + $0xc8] sm:$0xff]  }
 0x847   : > { %v3771_v60 = vsub.f32 %v1444_v48, %v1450_v59  ;;  %v2937_v48 = vld [vmem:[#allocation15 + $0x20] sm:$0xff]   ;;  %v2949_v59 = vld [vmem:[#allocation15 + $0x8] sm:$0xff]  }
 0x849   : > { %v1452_v61 = vmul.f32 %v3771_v60, %v3771_v60 }
 0x84b   : > { %1453 = vadd.xlane.f32.xlu1 %v1452_v61  ;;  %v2951_v61 = vld [vmem:[#allocation15 + $0x40] sm:$0xff]  }
 0x8d4   : > { %v1454_v27 = vpop.xlane.xlu1 %1453 }
 0x8d5   : > { %v1455_v28 = vmul.f32 0.0078125, %v1454_v27 }
 0x8d7   : > { %v1456_v29 = vadd.f32 1e-12, %v1455_v28 }
 0x8d9   : > { %2963 = vrsqrt.f32 %v1456_v29 }
 0x8e6   : > { %v2964_v30 = vpop.eup %2963 }
 0x8e7   : > { %v1458_v32 = vmul.f32 %v2964_v30, %v3771_v60  ;;  %v2950_v60 = vld [vmem:[#allocation15 + $0x88] sm:$0xff]  }
 0x8e9   : > { %v1465_v34 = vmul.f32 %v2446_v31, %v1458_v32 }
 0x8eb   : > { %v3782_v35 = vadd.f32 %v2447_v33, %v1465_v34 }
 0x8ed   : > { %v1473_v38 = vpack.c.bf16 %v3782_v35, %v3782_v35 }
 0x8ef   : > { %1721 = vmatmul.mubr.bf16.vlgmr.msra.gmra.mxu1 %v1473_v38  ;;  %1762 = vmatmul.mubr.bf16.vlgmr.msra.gmra.mxu0 %v1473_v38 }
 0x8f0   : > { %2569 = vmatpush3.bf16.msra.mxu1 %v2925_v36  ;;  %2591 = vmatpush3.bf16.msra.mxu0 %v2926_v37 }
 0x8f1   : > { %2570 = vmatprep.subr.bf16.mxu1 %v2927_v39  ;;  %2592 = vmatprep.subr.bf16.mxu0 %v2928_v40 }
 0x8f4   : > { %2571 = vmatpush3.bf16.msra.mxu1 %v2929_v41  ;;  %2593 = vmatpush3.bf16.msra.mxu0 %v2930_v42 }
 0x8f5   : > { %2572 = vmatprep.subr.bf16.mxu1 %v2931_v43  ;;  %2594 = vmatprep.subr.bf16.mxu0 %v2932_v44 }
 0x8f8   : > { %2573 = vmatpush3.bf16.msra.mxu1 %v2933_v45  ;;  %2595 = vmatpush3.bf16.msra.mxu0 %v2934_v46 }
 0x8f9   : > { %2574 = vmatprep.subr.bf16.mxu1 %v2935_v47  ;;  %2596 = vmatprep.subr.bf16.mxu0 %v2936_v0 }
 0x8fc   : > { %2575 = vmatpush3.bf16.msra.mxu1 %v2937_v48  ;;  %2597 = vmatpush3.bf16.msra.mxu0 %v2938_v49 }
 0x8fd   : > { %2576 = vmatprep.subr.bf16.mxu1 %v2939_v50  ;;  %2598 = vmatprep.subr.bf16.mxu0 %v2940_v51 }
 0x900   : > { %2577 = vmatpush3.bf16.msra.mxu1 %v2941_v52  ;;  %2599 = vmatpush3.bf16.msra.mxu0 %v2942_v53  ;;  %v2480_v52 = vld [vmem:[%s3883_s15] ss:$0 sm:$0xff] }
 0x901   : > { %2578 = vmatprep.subr.bf16.mxu1 %v2943_v54  ;;  %2600 = vmatprep.subr.bf16.mxu0 %v2944_v55 }
 0x904   : > { %2579 = vmatpush3.bf16.msra.mxu1 %v2945_v56  ;;  %2601 = vmatpush3.bf16.msra.mxu0 %v2946_v57 }
 0x905   : > { %2580 = vmatprep.subr.bf16.mxu1 %v2947_v58  ;;  %2602 = vmatprep.subr.bf16.mxu0 %v2948_v16 }
 0x908   : > { %2581 = vmatpush3.bf16.msra.mxu1 %v2949_v59  ;;  %2603 = vmatpush3.bf16.msra.mxu0 %v2950_v60 }
 0x909   : > { %2582 = vmatprep.subr.bf16.mxu1 %v2951_v61  ;;  %2604 = vmatprep.subr.bf16.mxu0 %v2952_v62 }
 0x90c   : > { %2583 = vmatpush3.bf16.msra.mxu1 %v2953_v63  ;;  %2605 = vmatpush3.bf16.msra.mxu0 %v2954_v1 }
 0x9af   : > { %v1722_v11 = vpop.f32.mrf.mxu1  ;;  %v1763_v12 = vpop.f32.mrf.mxu0 }
 0x9b0   : > { %v1723_v15 = vadd.f32 %v1722_v11, %v1511_v9  ;;  %v1764_v17 = vadd.f32 %v1763_v12, %v1519_v10 }
 0x9b1   : > { %v1724_v18 = vpop.f32.mrf.mxu1  ;;  %v1765_v19 = vpop.f32.mrf.mxu0 }
 0x9b2   : > { %v1775_v20 = vmul.f32 0.70710677, %v1723_v15  ;;  %v1777_v21 = vmul.f32 0.70710677, %v1764_v17  ;;  %v1725_v22 = vadd.f32 %v1724_v18, %v1515_v13  ;;  %v1766_v23 = vadd.f32 %v1765_v19, %v1523_v14 }
 0x9b3   : > { %v1726_v24 = vpop.f32.mrf.mxu1  ;;  %v1767_v25 = vpop.f32.mrf.mxu0  ;;  %v1770_v36 = vmul.f32 0.5, %v1723_v15  ;;  %v1772_v38 = vmul.f32 0.5, %v1764_v17 }
 0x9b4   : > { %2965 = verf.f32 %v1775_v20  ;;  %v1776_v26 = vmul.f32 0.70710677, %v1725_v22  ;;  %v1778_v29 = vmul.f32 0.70710677, %v1766_v23  ;;  %v1771_v39 = vmul.f32 0.5, %v1725_v22 }
 0x9b5   : > { %2967 = verf.f32 %v1777_v21  ;;  %v1727_v27 = vpop.f32.mrf.mxu1  ;;  %v1768_v28 = vpop.f32.mrf.mxu0  ;;  %v1773_v42 = vmul.f32 0.5, %v1766_v23 }
 0x9b6   : > { %2969 = verf.f32 %v1776_v26 }
 0x9b7   : > { %2971 = verf.f32 %v1778_v29 }
 0x9c1   : > { %v2966_v30 = vpop.eup %2965 }
 0x9c2   : > { %v2968_v31 = vpop.eup %2967  ;;  %v1783_v32 = vadd.f32 1.0, %v2966_v30 }
 0x9c3   : > { %v1785_v33 = vadd.f32 1.0, %v2968_v31  ;;  %v2970_v34 = vpop.eup %2969 }
 0x9c4   : > { %v2972_v37 = vpop.eup %2971  ;;  %v1784_v40 = vadd.f32 1.0, %v2970_v34  ;;  %v1787_v41 = vmul.f32 %v1783_v32, %v1770_v36 }
 0x9c5   : > { %v1786_v43 = vadd.f32 1.0, %v2972_v37  ;;  %v1789_v44 = vmul.f32 %v1785_v33, %v1772_v38 }
 0x9c6   : > { %v1788_v45 = vmul.f32 %v1784_v40, %v1771_v39  ;;  %v1791_v0 = vpack.c.bf16 %v1787_v41, %v1787_v41 }
 0x9c7   : > { %v1790_v46 = vmul.f32 %v1786_v43, %v1773_v42  ;;  %v1793_v49 = vpack.c.bf16 %v1789_v44, %v1789_v44 }
 0x9c8   : > { %v1792_v47 = vpack.c.bf16 %v1788_v45, %v1788_v45 }
 0x9c9   : > { %v1794_v48 = vpack.c.bf16 %v1790_v46, %v1790_v46 }
 0x9ca   : > { %2090 = vmatprep.mubr.bf16.mxu1 %v1792_v47 }
 0x9cb   : > { %2130 = vmatprep.mubr.bf16.mxu0 %v1794_v48  ;;  %2091 = vmatmul.mubr.bf16.vlgmr.msra.gmra.mxu1 %v1791_v0 }
 0x9cc   : > { %2131 = vmatmul.mubr.bf16.vlgmr.msra.gmra.mxu0 %v1793_v49 }
 0xa8b   : > { %v2584_v50 = vpop.f32.mrf.mxu1 }
 0xa8c   : > { %v2606_v51 = vpop.f32.mrf.mxu0 }
 0xa8d   : > { %v2585_v53 = vpop.f32.mrf.mxu1 }
 0xa8e   : > { %v2586_v54 = vadd.f32 %v2585_v53, %v2584_v50  ;;  %v2607_v55 = vpop.f32.mrf.mxu0 }
 0xa8f   : > { %v2587_v56 = vpop.f32.mrf.mxu1  ;;  %v2608_v58 = vadd.f32 %v2607_v55, %v2606_v51 }
 0xa90   : > { %v2093_v57 = vadd.f32 %v2586_v54, %v2480_v52  ;;  %v2609_v16 = vpop.f32.mrf.mxu0 }
 0xa91   : > { %v2588_v59 = vpop.f32.mrf.mxu1 }
 0xa92   : > { %v2133_v60 = vadd.f32 %v2608_v58, %v2093_v57  ;;  %v2610_v61 = vpop.f32.mrf.mxu0 }
 0xa94   : > { %v2138_v62 = vadd.f32 %v2133_v60, %v3782_v35 }
 0xa96   : > { %2141 = vadd.xlane.f32.xlu1 %v2138_v62 }
 0xb1f   : > { %v2142_v63 = vpop.xlane.xlu1 %2141 }
 0xb20   : > { %v2143_v1 = vmul.f32 0.0078125, %v2142_v63 }
 0xb22   : > { %v2144_v2 = vsub.f32 %v2138_v62, %v2143_v1 }
 0xb24   : > { %v2145_v3 = vmul.f32 %v2144_v2, %v2144_v2 }
 0xb26   : > { %2146 = vadd.xlane.f32.xlu1 %v2145_v3 }
 0xb27   : > { %3200 = shalt.err (!%p3197_p7)
}
 0xb28   : > { %s3201_s23 = scalar_lea.hbm %s3798_s20, 256  ;;  %s3205_s18 = scalar_lea.hbm %s3887_s19, 512 }
 0xb29   : > { %p3202_p12 = scmp.ne.s32.totalorder %s3798_s20, %s3201_s23  ;;  %p3206_p10 = scmp.lt.s32.totalorder %s3798_s20, %s3887_s19 }
 0xb2a   : > { %p3207_p11 = scmp.lt.s32.totalorder %s3205_s18, %s3201_s23 }
 0xb2b   : > { %p3203_p0 = pnand %p3202_p12, %p3948_p8 }
 0xb2c   : > { %p3208_p13 = por %p3207_p11, %p3206_p10 }
 0xb2d   : > { %p3204_p9 = pneg %p3203_p0 }
 0xb2f   : > { %p3209_p5 = pnand %p3208_p13, %p3204_p9 }
 0xb31   : > { %3212 = shalt.err (!%p3209_p5)
}
 0xb32   : > { %s3320_s6 = smov 128   ;;  %s3321_s29 = smov 8  }
 0xb33   : > { %2745 = dma.vmem_to_hbm [thread:$0]  (%p3948_p8), %s3800_s8, 256, %s3798_s20, %s2173_s0, %s3320_s6, %s3320_s6, %s3321_s29  }
 0xb34   : > { %s3949_s17 = sld [smem:[#allocation42_spill]]  ;;  %s2517_s1 = sshll.u32 %s3444_s2, 7 }
 0xb35   : > { %s3950_s23 = sld [smem:[#allocation43_spill]]  ;;  %s742_s24 = scalar_lea.vmem [#allocation17], %s2394_s22 }
 0xb36   : > { %s2186_s8 = sshll.u32 %s742_s24, 4  ;;  %s3951_s18 = sld [smem:[#allocation44_spill]]  ;;  %s2187_s8 = int_to_ptr.vmem [resolvable:$true] %s2186_s8 }
 0xb37   : > { %s2168_s3 = scalar_lea.sflag [#allocation5], %s3642_s28  ;;  %s3213_s6 = scalar_lea.vmem %s2187_s8, 128 }
 0xb38   : > { %p3214_p1 = scmp.ne.s32.totalorder %s2187_s8, %s3213_s6  ;;  %s3322_s29 = smov [#allocation17]  }
 0xb39   : > { %s3217_s26 = sshll.u32 %s3322_s29, 4  ;;  %s3218_s26 = int_to_ptr.vmem [resolvable:$false] %s3217_s26 }
 0xb3a   : > { %v2513_v7 = vld [vmem:[%s3949_s17] ss:$0 sm:$0xff]  ;;  %p3215_p4 = pnand %p3214_p1, %p3948_p8  ;;  %s3219_s2 = scalar_lea.vmem %s3218_s26, 256 }
 0xb3b   : > { %v2514_v9 = vld [vmem:[%s3950_s23] ss:$0 sm:$0xff]  ;;  %p3220_p2 = scmp.lt.s32.totalorder %s2187_s8, %s3218_s26  ;;  %p3221_p3 = scmp.lt.s32.totalorder %s3219_s2, %s3213_s6 }
 0xb3c   : > { %s2184_s14 = scalar_lea.hbm %s3951_s18, %s2517_s1  ;;  %p3216_p6 = pneg %p3215_p4 }
 0xb3d   : > { %p3222_p7 = por %p3221_p3, %p3220_p2 }
 0xb3f   : > { %p3223_p12 = pnand %p3222_p7, %p3216_p6 }
 0xbaf   : > { %v2147_v35 = vpop.xlane.xlu1 %2146 }
 0xbb0   : > { %v2148_v4 = vmul.f32 0.0078125, %v2147_v35 }
 0xbb2   : > { %v2149_v5 = vadd.f32 1e-12, %v2148_v4 }
 0xbb4   : > { %2973 = vrsqrt.f32 %v2149_v5 }
 0xbc1   : > { %v2974_v6 = vpop.eup %2973 }
 0xbc2   : > { %v2151_v8 = vmul.f32 %v2974_v6, %v2144_v2 }
 0xbc4   : > { %v2158_v10 = vmul.f32 %v2513_v7, %v2151_v8 }
 0xbc6   : > { %v2165_v11 = vadd.f32 %v2514_v9, %v2158_v10 }
 0xbc8   : > { %2166 = vst [vmem:[%s742_s24] sm:$0xff] %v2165_v11 }
 0xbc9   : > { %3226 = shalt.err (!%p3223_p12)
}
 0xbca   : > { %s3227_s22 = scalar_lea.hbm %s2184_s14, 128  ;;  %s3231_s17 = scalar_lea.hbm %s3951_s18, 256 }
 0xbcb   : > { %p3228_p0 = scmp.ne.s32.totalorder %s2184_s14, %s3227_s22  ;;  %p3232_p11 = scmp.lt.s32.totalorder %s2184_s14, %s3951_s18 }
 0xbcc   : > { %p3233_p13 = scmp.lt.s32.totalorder %s3231_s17, %s3227_s22 }
 0xbcd   : > { %p3229_p9 = pnand %p3228_p0, %p3948_p8 }
 0xbce   : > { %p3234_p5 = por %p3233_p13, %p3232_p11 }
 0xbcf   : > { %p3230_p10 = pneg %p3229_p9 }
 0xbd1   : > { %p3235_p1 = pnand %p3234_p5, %p3230_p10 }
 0xbd3   : > { %3238 = shalt.err (!%p3235_p1)
}
 0xbd4   : > { %2744 = dma.vmem_to_hbm [thread:$0]  (%p3948_p8), %s2187_s8, 128, %s2184_s14, %s2168_s3  }
 0xbd5 PF: > { %s3952_s23 = sld [smem:[#allocation28_spill]]  ;;  %p3955_p6 = scmp.ge.s32.totalorder %s3301_s21, 2 }
 0xbd6   : > { %s3953_s1 = sld [smem:[#allocation32_spill]] }
 0xbdb   : > { %s2214_s24 = sand.u32 1, %s3952_s23  }
 0xbdc   : > { %p3954_p4 = scmp.ne.s32.totalorder %s3953_s1, 0  ;;  %s2215_s20 = scalar_lea.sflag [#allocation5], %s2214_s24 }
 0xbde   : > { %p2775_p2 = pnand %p3955_p6, %p3954_p4 }
 0xbe0   : > { %p2776_p3 = pneg %p2775_p2 }
 0xbe2   : > { %3280 = dma.done.wait (%p2776_p3), %s2215_s20, 128  }
 0xbe3   : > { %3282 = vsyncadd (%p2776_p3), %s2215_s20, 4294967168  ;;  %s2224_s0 = scalar_lea.sflag [#allocation19], %s2214_s24 }
 0xbe4   : > { %3284 = dma.done.wait (%p2776_p3), %s2224_s0, 256  }
 0xbe5   : > { %3286 = vsyncadd (%p2776_p3), %s2224_s0, 4294967040  ;;  %s3956_s21 = sld [smem:[#allocation30_spill]]  ;;  %s3959_s0 = smov %s3293_s30 }
 0xbe6   : > { %s3957_s6 = sld [smem:[#allocation29_spill]] }
 0xbe7   : > { %s3958_s20 = sld [smem:[#allocation31_spill]] }
 0xbeb   : > { %p42_p8 = scmp.ge.s32.totalorder %s3956_s21, 4  }
 0xbec   : > { %s3960_s30 = smov %s3957_s6 }
 0xbed   :  { %44 = sbr.rel (!%p42_p8) target bundleno = 25 (0x19), region = 192 }
 0xbf2   :  { %2229 = vsyncpa [#allocation4], 1 }
 0xbf3   :  { %2231 = vsyncpa [#allocation4 + $0x1], 1 }
 0xbf4   :  { %2232 = vsyncpa [#allocation7], 1 }
 0xbf5   :  { %2234 = vsyncpa [#allocation7 + $0x1], 1 }
 0xbf6   :  { %2235 = vsyncpa [#allocation10], 1 }
 0xbf7   :  { %2236 = vsyncpa [#allocation13], 1 }
 0xbf8   :  { %2237 = vsyncpa [#allocation16], 1 }
 0xbf9   :  { %2238 = vsyncpa [#allocation5], 1 }
 0xbfa   :  { %2240 = vsyncpa [#allocation5 + $0x1], 1 }
 0xbfb   :  { %2241 = vsyncpa [#allocation19], 1 }
 0xbfc   :  { %2243 = vsyncpa [#allocation19 + $0x1], 1 }

</bundles_post_ra>
